<compile_context>
chip_gen: v7x
topology: tpu7x:2x2x1
jax: 0.10.0
libtpu: 0.0.40
codegen_flags: <defaults>
</compile_context>

<pallas_src>
import functools
import math

import jax
import jax.numpy as jnp
from jax import lax
from jax.experimental import pallas as pl
from jax.experimental.pallas import tpu as pltpu


def _linear_attention_kernel(
    x_ref,        # (C, N)        input feature map for this batch element
    wqkv_ref,     # (3*hidden, C) to_qkv 1x1-conv weight
    wout_ref,     # (C, hidden)   to_out 1x1-conv weight
    bout_ref,     # (C, 1)        to_out conv bias
    gamma_ref,    # (C, 1)        GroupNorm weight
    beta_ref,     # (C, 1)        GroupNorm bias
    o_ref,        # (C, N)        output
    *,
    heads: int,
    dim_head: int,
    eps: float,
):
    scale = dim_head ** (-0.5)
    hidden = heads * dim_head

    x = x_ref[...].astype(jnp.float32)                     # (C, N)
    n = x.shape[-1]
    c_out = o_ref.shape[0]

    # --- to_qkv: 1x1 conv == channel matmul on the MXU ------------------------
    qkv = jnp.dot(wqkv_ref[...], x,
                  preferred_element_type=jnp.float32)      # (3*hidden, N)

    # --- per-head linear attention (unrolled; heads is small & static) --------
    outs = []
    for h in range(heads):
        lo = h * dim_head
        q = qkv[lo:lo + dim_head]                           # (d, N)
        k = qkv[hidden + lo:hidden + lo + dim_head]         # (d, N)
        v = qkv[2 * hidden + lo:2 * hidden + lo + dim_head] # (d, N)

        # softmax(q) over the head-channel axis (sublane reduce), then * scale
        q = q - jnp.max(q, axis=0, keepdims=True)
        q = jnp.exp(q)
        q = (q / jnp.sum(q, axis=0, keepdims=True)) * scale

        # softmax(k) over the spatial axis (lane reduce)
        k = k - jnp.max(k, axis=1, keepdims=True)
        k = jnp.exp(k)
        k = k / jnp.sum(k, axis=1, keepdims=True)

        # context[d, e] = sum_n k[d, n] * v[e, n]
        context = lax.dot_general(
            k, v, (((1,), (1,)), ((), ())),
            preferred_element_type=jnp.float32)             # (d, d)

        # out[e, n] = sum_d context[d, e] * q[d, n]
        out_h = lax.dot_general(
            context, q, (((0,), (0,)), ((), ())),
            preferred_element_type=jnp.float32)             # (d, N)
        outs.append(out_h)

    attn = jnp.concatenate(outs, axis=0)                    # (hidden, N)

    # --- to_out: 1x1 conv (hidden -> dim) + bias -------------------------------
    y = jnp.dot(wout_ref[...], attn,
                preferred_element_type=jnp.float32)         # (C, N)
    y = y + bout_ref[...]                                   # (C,1) broadcast over lanes

    # --- GroupNorm(1, C): normalize over all channels & spatial ----------------
    denom = 1.0 / float(c_out * n)
    mean = jnp.sum(jnp.sum(y, axis=1, keepdims=True),
                   axis=0, keepdims=True) * denom           # (1, 1)
    diff = y - mean
    var = jnp.sum(jnp.sum(diff * diff, axis=1, keepdims=True),
                  axis=0, keepdims=True) * denom            # (1, 1)
    y = diff * lax.rsqrt(var + eps)
    o_ref[...] = y * gamma_ref[...] + beta_ref[...]


def linear_attention(x, w_qkv, w_out, b_out, gamma, beta, *,
                     heads: int, dim_head: int, eps: float = 1e-5):
    """Pallas implementation of LinearAttention.forward.

    x:      (B, C, H, W) float32
    w_qkv:  (3*heads*dim_head, C)   -- Conv2d(dim, 3*hidden, 1, bias=False).weight[..., 0, 0]
    w_out:  (C, heads*dim_head)     -- Conv2d(hidden, dim, 1).weight[..., 0, 0]
    b_out:  (C,)                    -- Conv2d bias
    gamma, beta: (C,)               -- GroupNorm(1, C) affine params
    returns (B, C, H, W) float32
    """
    B, C, H, W = x.shape
    N = H * W
    hidden = heads * dim_head
    assert w_qkv.shape == (3 * hidden, C)
    assert w_out.shape == (C, hidden)

    x2 = x.reshape(B, C, N).astype(jnp.float32)
    bout2 = b_out.reshape(C, 1).astype(jnp.float32)
    gamma2 = gamma.reshape(C, 1).astype(jnp.float32)
    beta2 = beta.reshape(C, 1).astype(jnp.float32)

    kernel = functools.partial(
        _linear_attention_kernel, heads=heads, dim_head=dim_head, eps=eps)

    out = pl.pallas_call(
        kernel,
        out_shape=jax.ShapeDtypeStruct((B, C, N), jnp.float32),
        grid=(B,),
        in_specs=[
            pl.BlockSpec((None, C, N), lambda b: (b, 0, 0)),     # x, per-batch block
            pl.BlockSpec((3 * hidden, C), lambda b: (0, 0)),     # w_qkv (resident)
            pl.BlockSpec((C, hidden), lambda b: (0, 0)),         # w_out
            pl.BlockSpec((C, 1), lambda b: (0, 0)),              # b_out
            pl.BlockSpec((C, 1), lambda b: (0, 0)),              # gamma
            pl.BlockSpec((C, 1), lambda b: (0, 0)),              # beta
        ],
        out_specs=pl.BlockSpec((None, C, N), lambda b: (b, 0, 0)),
        compiler_params=pltpu.CompilerParams(
            dimension_semantics=("parallel",),                   # shard batch across TCs (v7x)
        ),
    )(x2, w_qkv.astype(jnp.float32), w_out.astype(jnp.float32),
      bout2, gamma2, beta2)

    return out.reshape(B, C, H, W)


def _reference(x, w_qkv, w_out, b_out, gamma, beta, heads, dim_head, eps=1e-5):
    """Pure-JAX reference mirroring the PyTorch forward exactly."""
    B, C, H, W = x.shape
    N = H * W
    hidden = heads * dim_head
    scale = dim_head ** (-0.5)
    hi = lax.Precision.HIGHEST

    xf = x.reshape(B, C, N)
    qkv = jnp.einsum('oc,bcn->bon', w_qkv, xf, precision=hi)
    q, k, v = jnp.split(qkv, 3, axis=1)
    q = q.reshape(B, heads, dim_head, N)
    k = k.reshape(B, heads, dim_head, N)
    v = v.reshape(B, heads, dim_head, N)

    q = jax.nn.softmax(q, axis=-2) * scale
    k = jax.nn.softmax(k, axis=-1)
    context = jnp.einsum('bhdn,bhen->bhde', k, v, precision=hi)
    out = jnp.einsum('bhde,bhdn->bhen', context, q, precision=hi)
    out = out.reshape(B, hidden, N)

    y = jnp.einsum('oc,bcn->bon', w_out, out, precision=hi) + b_out[None, :, None]
    mean = jnp.mean(y, axis=(1, 2), keepdims=True)
    var = jnp.mean((y - mean) ** 2, axis=(1, 2), keepdims=True)
    y = (y - mean) * lax.rsqrt(var + eps)
    y = y * gamma[None, :, None] + beta[None, :, None]
    return y.reshape(B, C, H, W)


if __name__ == "__main__":
    key = jax.random.PRNGKey(0)
    B, C, H, W = 2, 4, 16, 16          # dim = C = 4
    heads, dim_head = 4, 32            # hidden = 128
    hidden = heads * dim_head

    ks = jax.random.split(key, 6)
    x = jax.random.normal(ks[0], (B, C, H, W), dtype=jnp.float32)
    w_qkv = jax.random.normal(ks[1], (3 * hidden, C), dtype=jnp.float32) * (C ** -0.5)
    w_out = jax.random.normal(ks[2], (C, hidden), dtype=jnp.float32) * (hidden ** -0.5)
    b_out = 0.1 * jax.random.normal(ks[3], (C,), dtype=jnp.float32)
    gamma = 1.0 + 0.1 * jax.random.normal(ks[4], (C,), dtype=jnp.float32)
    beta = 0.1 * jax.random.normal(ks[5], (C,), dtype=jnp.float32)

    out = linear_attention(x, w_qkv, w_out, b_out, gamma, beta,
                           heads=heads, dim_head=dim_head)
    out = jax.block_until_ready(out)

    ref = _reference(x, w_qkv, w_out, b_out, gamma, beta, heads, dim_head)
    assert out.shape == (B, C, H, W), out.shape
    assert out.dtype == jnp.float32, out.dtype
    max_err = float(jnp.max(jnp.abs(out - ref)))
    assert jnp.allclose(out, ref, atol=5e-3, rtol=5e-3), max_err

    print("KERNEL_OK")
</pallas_src>

<mosaic_0001>
module attributes {stable_mosaic.version = 11 : i64} {
  func.func @_linear_attention_kernel(%arg0: i32, %arg1: memref<1x4x256xf32, #tpu.memory_space<vmem>>, %arg2: memref<384x4xf32, #tpu.memory_space<vmem>>, %arg3: memref<4x128xf32, #tpu.memory_space<vmem>>, %arg4: memref<4x1xf32, #tpu.memory_space<vmem>>, %arg5: memref<4x1xf32, #tpu.memory_space<vmem>>, %arg6: memref<4x1xf32, #tpu.memory_space<vmem>>, %arg7: memref<1x4x256xf32, #tpu.memory_space<vmem>>) attributes {dimension_semantics = [#tpu.dimension_semantics<parallel>], iteration_bounds = array<i64: 2>, scalar_prefetch = 0 : i64, scratch_operands = 0 : i64, tpu.core_type = #tpu.core_type<tc>, window_params = [{transform_indices = @transform_0, window_bounds = array<i64: 1, 4, 256>}, {pipeline_mode = #tpu.pipeline_mode<synchronous>, transform_indices = @transform_1, window_bounds = array<i64: 384, 4>}, {pipeline_mode = #tpu.pipeline_mode<synchronous>, transform_indices = @transform_2, window_bounds = array<i64: 4, 128>}, {pipeline_mode = #tpu.pipeline_mode<synchronous>, transform_indices = @transform_3, window_bounds = array<i64: 4, 1>}, {pipeline_mode = #tpu.pipeline_mode<synchronous>, transform_indices = @transform_4, window_bounds = array<i64: 4, 1>}, {pipeline_mode = #tpu.pipeline_mode<synchronous>, transform_indices = @transform_5, window_bounds = array<i64: 4, 1>}, {transform_indices = @transform_6, window_bounds = array<i64: 1, 4, 256>}]} {
    %c0 = arith.constant 0 : index
    %c0_0 = arith.constant 0 : index
    %c0_1 = arith.constant 0 : index
    %0 = vector.load %arg1[%c0, %c0_0, %c0_1] : memref<1x4x256xf32, #tpu.memory_space<vmem>>, vector<1x4x256xf32>
    %1 = vector.shape_cast %0 : vector<1x4x256xf32> to vector<4x256xf32>
    %c0_2 = arith.constant 0 : index
    %c0_3 = arith.constant 0 : index
    %2 = vector.load %arg2[%c0_2, %c0_3] : memref<384x4xf32, #tpu.memory_space<vmem>>, vector<384x4xf32>
    %cst = arith.constant dense<0.000000e+00> : vector<384x256xf32>
    %3 = tpu.matmul %2, %1, %cst {dimension_numbers = #tpu.dot_dimension_numbers<[1], [0], [0], [1], [0, 0, 1, 1], [], []>} : vector<384x4xf32>, vector<4x256xf32>, vector<384x256xf32> -> vector<384x256xf32>
    %4 = vector.extract_strided_slice %3 {offsets = [0, 0], sizes = [32, 256], strides = [1, 1]} : vector<384x256xf32> to vector<32x256xf32>
    %5 = vector.extract_strided_slice %3 {offsets = [128, 0], sizes = [32, 256], strides = [1, 1]} : vector<384x256xf32> to vector<32x256xf32>
    %6 = vector.extract_strided_slice %3 {offsets = [256, 0], sizes = [32, 256], strides = [1, 1]} : vector<384x256xf32> to vector<32x256xf32>
    %cst_4 = arith.constant dense<0xFF800000> : vector<256xf32>
    %7 = vector.multi_reduction <maximumf>, %4, %cst_4 [0] : vector<32x256xf32> to vector<256xf32>
    %8 = vector.shape_cast %7 : vector<256xf32> to vector<1x256xf32>
    %9 = vector.broadcast %8 : vector<1x256xf32> to vector<32x256xf32>
    %10 = arith.subf %4, %9 : vector<32x256xf32>
    %11 = math.exp %10 : vector<32x256xf32>
    %cst_5 = arith.constant dense<0.000000e+00> : vector<256xf32>
    %12 = vector.multi_reduction <add>, %11, %cst_5 [0] : vector<32x256xf32> to vector<256xf32>
    %13 = vector.shape_cast %12 : vector<256xf32> to vector<1x256xf32>
    %14 = vector.broadcast %13 : vector<1x256xf32> to vector<32x256xf32>
    %15 = arith.divf %11, %14 : vector<32x256xf32>
    %cst_6 = arith.constant 0.176776692 : f32
    %16 = vector.broadcast %cst_6 : f32 to vector<32x256xf32>
    %17 = arith.mulf %15, %16 : vector<32x256xf32>
    %cst_7 = arith.constant dense<0xFF800000> : vector<32xf32>
    %18 = vector.multi_reduction <maximumf>, %5, %cst_7 [1] : vector<32x256xf32> to vector<32xf32>
    %19 = vector.shape_cast %18 : vector<32xf32> to vector<32x1xf32>
    %20 = vector.broadcast %19 : vector<32x1xf32> to vector<32x256xf32>
    %21 = arith.subf %5, %20 : vector<32x256xf32>
    %22 = math.exp %21 : vector<32x256xf32>
    %cst_8 = arith.constant dense<0.000000e+00> : vector<32xf32>
    %23 = vector.multi_reduction <add>, %22, %cst_8 [1] : vector<32x256xf32> to vector<32xf32>
    %24 = vector.shape_cast %23 : vector<32xf32> to vector<32x1xf32>
    %25 = vector.broadcast %24 : vector<32x1xf32> to vector<32x256xf32>
    %26 = arith.divf %22, %25 : vector<32x256xf32>
    %cst_9 = arith.constant dense<0.000000e+00> : vector<32x32xf32>
    %27 = tpu.matmul %26, %6, %cst_9 {dimension_numbers = #tpu.dot_dimension_numbers<[1], [1], [0], [0], [0, 0, 1, 0], [], []>} : vector<32x256xf32>, vector<32x256xf32>, vector<32x32xf32> -> vector<32x32xf32>
    %cst_10 = arith.constant dense<0.000000e+00> : vector<32x256xf32>
    %28 = tpu.matmul %27, %17, %cst_10 {dimension_numbers = #tpu.dot_dimension_numbers<[0], [0], [1], [1], [0, 1, 1, 1], [], []>} : vector<32x32xf32>, vector<32x256xf32>, vector<32x256xf32> -> vector<32x256xf32>
    %29 = vector.extract_strided_slice %3 {offsets = [32, 0], sizes = [32, 256], strides = [1, 1]} : vector<384x256xf32> to vector<32x256xf32>
    %30 = vector.extract_strided_slice %3 {offsets = [160, 0], sizes = [32, 256], strides = [1, 1]} : vector<384x256xf32> to vector<32x256xf32>
    %31 = vector.extract_strided_slice %3 {offsets = [288, 0], sizes = [32, 256], strides = [1, 1]} : vector<384x256xf32> to vector<32x256xf32>
    %cst_11 = arith.constant dense<0xFF800000> : vector<256xf32>
    %32 = vector.multi_reduction <maximumf>, %29, %cst_11 [0] : vector<32x256xf32> to vector<256xf32>
    %33 = vector.shape_cast %32 : vector<256xf32> to vector<1x256xf32>
    %34 = vector.broadcast %33 : vector<1x256xf32> to vector<32x256xf32>
    %35 = arith.subf %29, %34 : vector<32x256xf32>
    %36 = math.exp %35 : vector<32x256xf32>
    %cst_12 = arith.constant dense<0.000000e+00> : vector<256xf32>
    %37 = vector.multi_reduction <add>, %36, %cst_12 [0] : vector<32x256xf32> to vector<256xf32>
    %38 = vector.shape_cast %37 : vector<256xf32> to vector<1x256xf32>
    %39 = vector.broadcast %38 : vector<1x256xf32> to vector<32x256xf32>
    %40 = arith.divf %36, %39 : vector<32x256xf32>
    %cst_13 = arith.constant 0.176776692 : f32
    %41 = vector.broadcast %cst_13 : f32 to vector<32x256xf32>
    %42 = arith.mulf %40, %41 : vector<32x256xf32>
    %cst_14 = arith.constant dense<0xFF800000> : vector<32xf32>
    %43 = vector.multi_reduction <maximumf>, %30, %cst_14 [1] : vector<32x256xf32> to vector<32xf32>
    %44 = vector.shape_cast %43 : vector<32xf32> to vector<32x1xf32>
    %45 = vector.broadcast %44 : vector<32x1xf32> to vector<32x256xf32>
    %46 = arith.subf %30, %45 : vector<32x256xf32>
    %47 = math.exp %46 : vector<32x256xf32>
    %cst_15 = arith.constant dense<0.000000e+00> : vector<32xf32>
    %48 = vector.multi_reduction <add>, %47, %cst_15 [1] : vector<32x256xf32> to vector<32xf32>
    %49 = vector.shape_cast %48 : vector<32xf32> to vector<32x1xf32>
    %50 = vector.broadcast %49 : vector<32x1xf32> to vector<32x256xf32>
    %51 = arith.divf %47, %50 : vector<32x256xf32>
    %cst_16 = arith.constant dense<0.000000e+00> : vector<32x32xf32>
    %52 = tpu.matmul %51, %31, %cst_16 {dimension_numbers = #tpu.dot_dimension_numbers<[1], [1], [0], [0], [0, 0, 1, 0], [], []>} : vector<32x256xf32>, vector<32x256xf32>, vector<32x32xf32> -> vector<32x32xf32>
    %cst_17 = arith.constant dense<0.000000e+00> : vector<32x256xf32>
    %53 = tpu.matmul %52, %42, %cst_17 {dimension_numbers = #tpu.dot_dimension_numbers<[0], [0], [1], [1], [0, 1, 1, 1], [], []>} : vector<32x32xf32>, vector<32x256xf32>, vector<32x256xf32> -> vector<32x256xf32>
    %54 = vector.extract_strided_slice %3 {offsets = [64, 0], sizes = [32, 256], strides = [1, 1]} : vector<384x256xf32> to vector<32x256xf32>
    %55 = vector.extract_strided_slice %3 {offsets = [192, 0], sizes = [32, 256], strides = [1, 1]} : vector<384x256xf32> to vector<32x256xf32>
    %56 = vector.extract_strided_slice %3 {offsets = [320, 0], sizes = [32, 256], strides = [1, 1]} : vector<384x256xf32> to vector<32x256xf32>
    %cst_18 = arith.constant dense<0xFF800000> : vector<256xf32>
    %57 = vector.multi_reduction <maximumf>, %54, %cst_18 [0] : vector<32x256xf32> to vector<256xf32>
    %58 = vector.shape_cast %57 : vector<256xf32> to vector<1x256xf32>
    %59 = vector.broadcast %58 : vector<1x256xf32> to vector<32x256xf32>
    %60 = arith.subf %54, %59 : vector<32x256xf32>
    %61 = math.exp %60 : vector<32x256xf32>
    %cst_19 = arith.constant dense<0.000000e+00> : vector<256xf32>
    %62 = vector.multi_reduction <add>, %61, %cst_19 [0] : vector<32x256xf32> to vector<256xf32>
    %63 = vector.shape_cast %62 : vector<256xf32> to vector<1x256xf32>
    %64 = vector.broadcast %63 : vector<1x256xf32> to vector<32x256xf32>
    %65 = arith.divf %61, %64 : vector<32x256xf32>
    %cst_20 = arith.constant 0.176776692 : f32
    %66 = vector.broadcast %cst_20 : f32 to vector<32x256xf32>
    %67 = arith.mulf %65, %66 : vector<32x256xf32>
    %cst_21 = arith.constant dense<0xFF800000> : vector<32xf32>
    %68 = vector.multi_reduction <maximumf>, %55, %cst_21 [1] : vector<32x256xf32> to vector<32xf32>
    %69 = vector.shape_cast %68 : vector<32xf32> to vector<32x1xf32>
    %70 = vector.broadcast %69 : vector<32x1xf32> to vector<32x256xf32>
    %71 = arith.subf %55, %70 : vector<32x256xf32>
    %72 = math.exp %71 : vector<32x256xf32>
    %cst_22 = arith.constant dense<0.000000e+00> : vector<32xf32>
    %73 = vector.multi_reduction <add>, %72, %cst_22 [1] : vector<32x256xf32> to vector<32xf32>
    %74 = vector.shape_cast %73 : vector<32xf32> to vector<32x1xf32>
    %75 = vector.broadcast %74 : vector<32x1xf32> to vector<32x256xf32>
    %76 = arith.divf %72, %75 : vector<32x256xf32>
    %cst_23 = arith.constant dense<0.000000e+00> : vector<32x32xf32>
    %77 = tpu.matmul %76, %56, %cst_23 {dimension_numbers = #tpu.dot_dimension_numbers<[1], [1], [0], [0], [0, 0, 1, 0], [], []>} : vector<32x256xf32>, vector<32x256xf32>, vector<32x32xf32> -> vector<32x32xf32>
    %cst_24 = arith.constant dense<0.000000e+00> : vector<32x256xf32>
    %78 = tpu.matmul %77, %67, %cst_24 {dimension_numbers = #tpu.dot_dimension_numbers<[0], [0], [1], [1], [0, 1, 1, 1], [], []>} : vector<32x32xf32>, vector<32x256xf32>, vector<32x256xf32> -> vector<32x256xf32>
    %79 = vector.extract_strided_slice %3 {offsets = [96, 0], sizes = [32, 256], strides = [1, 1]} : vector<384x256xf32> to vector<32x256xf32>
    %80 = vector.extract_strided_slice %3 {offsets = [224, 0], sizes = [32, 256], strides = [1, 1]} : vector<384x256xf32> to vector<32x256xf32>
    %81 = vector.extract_strided_slice %3 {offsets = [352, 0], sizes = [32, 256], strides = [1, 1]} : vector<384x256xf32> to vector<32x256xf32>
    %cst_25 = arith.constant dense<0xFF800000> : vector<256xf32>
    %82 = vector.multi_reduction <maximumf>, %79, %cst_25 [0] : vector<32x256xf32> to vector<256xf32>
    %83 = vector.shape_cast %82 : vector<256xf32> to vector<1x256xf32>
    %84 = vector.broadcast %83 : vector<1x256xf32> to vector<32x256xf32>
    %85 = arith.subf %79, %84 : vector<32x256xf32>
    %86 = math.exp %85 : vector<32x256xf32>
    %cst_26 = arith.constant dense<0.000000e+00> : vector<256xf32>
    %87 = vector.multi_reduction <add>, %86, %cst_26 [0] : vector<32x256xf32> to vector<256xf32>
    %88 = vector.shape_cast %87 : vector<256xf32> to vector<1x256xf32>
    %89 = vector.broadcast %88 : vector<1x256xf32> to vector<32x256xf32>
    %90 = arith.divf %86, %89 : vector<32x256xf32>
    %cst_27 = arith.constant 0.176776692 : f32
    %91 = vector.broadcast %cst_27 : f32 to vector<32x256xf32>
    %92 = arith.mulf %90, %91 : vector<32x256xf32>
    %cst_28 = arith.constant dense<0xFF800000> : vector<32xf32>
    %93 = vector.multi_reduction <maximumf>, %80, %cst_28 [1] : vector<32x256xf32> to vector<32xf32>
    %94 = vector.shape_cast %93 : vector<32xf32> to vector<32x1xf32>
    %95 = vector.broadcast %94 : vector<32x1xf32> to vector<32x256xf32>
    %96 = arith.subf %80, %95 : vector<32x256xf32>
    %97 = math.exp %96 : vector<32x256xf32>
    %cst_29 = arith.constant dense<0.000000e+00> : vector<32xf32>
    %98 = vector.multi_reduction <add>, %97, %cst_29 [1] : vector<32x256xf32> to vector<32xf32>
    %99 = vector.shape_cast %98 : vector<32xf32> to vector<32x1xf32>
    %100 = vector.broadcast %99 : vector<32x1xf32> to vector<32x256xf32>
    %101 = arith.divf %97, %100 : vector<32x256xf32>
    %cst_30 = arith.constant dense<0.000000e+00> : vector<32x32xf32>
    %102 = tpu.matmul %101, %81, %cst_30 {dimension_numbers = #tpu.dot_dimension_numbers<[1], [1], [0], [0], [0, 0, 1, 0], [], []>} : vector<32x256xf32>, vector<32x256xf32>, vector<32x32xf32> -> vector<32x32xf32>
    %cst_31 = arith.constant dense<0.000000e+00> : vector<32x256xf32>
    %103 = tpu.matmul %102, %92, %cst_31 {dimension_numbers = #tpu.dot_dimension_numbers<[0], [0], [1], [1], [0, 1, 1, 1], [], []>} : vector<32x32xf32>, vector<32x256xf32>, vector<32x256xf32> -> vector<32x256xf32>
    %104 = tpu.concatenate %28, %53, %78, %103 in 0 : vector<32x256xf32>, vector<32x256xf32>, vector<32x256xf32>, vector<32x256xf32> -> vector<128x256xf32>
    %c0_32 = arith.constant 0 : index
    %c0_33 = arith.constant 0 : index
    %105 = vector.load %arg3[%c0_32, %c0_33] : memref<4x128xf32, #tpu.memory_space<vmem>>, vector<4x128xf32>
    %cst_34 = arith.constant dense<0.000000e+00> : vector<4x256xf32>
    %106 = tpu.matmul %105, %104, %cst_34 {dimension_numbers = #tpu.dot_dimension_numbers<[1], [0], [0], [1], [0, 0, 1, 1], [], []>} : vector<4x128xf32>, vector<128x256xf32>, vector<4x256xf32> -> vector<4x256xf32>
    %c0_35 = arith.constant 0 : index
    %c0_36 = arith.constant 0 : index
    %107 = vector.load %arg4[%c0_35, %c0_36] : memref<4x1xf32, #tpu.memory_space<vmem>>, vector<4x1xf32>
    %108 = vector.broadcast %107 : vector<4x1xf32> to vector<4x256xf32>
    %109 = arith.addf %106, %108 : vector<4x256xf32>
    %cst_37 = arith.constant dense<0.000000e+00> : vector<4xf32>
    %110 = vector.multi_reduction <add>, %109, %cst_37 [1] : vector<4x256xf32> to vector<4xf32>
    %111 = vector.shape_cast %110 : vector<4xf32> to vector<4x1xf32>
    %cst_38 = arith.constant dense<0.000000e+00> : vector<1xf32>
    %112 = vector.multi_reduction <add>, %111, %cst_38 [0] : vector<4x1xf32> to vector<1xf32>
    %113 = vector.shape_cast %112 : vector<1xf32> to vector<1x1xf32>
    %cst_39 = arith.constant 9.765625E-4 : f32
    %114 = vector.broadcast %cst_39 : f32 to vector<1x1xf32>
    %115 = arith.mulf %113, %114 : vector<1x1xf32>
    %116 = vector.broadcast %115 : vector<1x1xf32> to vector<4x256xf32>
    %117 = arith.subf %109, %116 : vector<4x256xf32>
    %118 = arith.mulf %117, %117 : vector<4x256xf32>
    %cst_40 = arith.constant dense<0.000000e+00> : vector<4xf32>
    %119 = vector.multi_reduction <add>, %118, %cst_40 [1] : vector<4x256xf32> to vector<4xf32>
    %120 = vector.shape_cast %119 : vector<4xf32> to vector<4x1xf32>
    %cst_41 = arith.constant dense<0.000000e+00> : vector<1xf32>
    %121 = vector.multi_reduction <add>, %120, %cst_41 [0] : vector<4x1xf32> to vector<1xf32>
    %122 = vector.shape_cast %121 : vector<1xf32> to vector<1x1xf32>
    %cst_42 = arith.constant 9.765625E-4 : f32
    %123 = vector.broadcast %cst_42 : f32 to vector<1x1xf32>
    %124 = arith.mulf %122, %123 : vector<1x1xf32>
    %cst_43 = arith.constant 9.99999974E-6 : f32
    %125 = vector.broadcast %cst_43 : f32 to vector<1x1xf32>
    %126 = arith.addf %124, %125 : vector<1x1xf32>
    %127 = math.rsqrt %126 : vector<1x1xf32>
    %128 = vector.broadcast %127 : vector<1x1xf32> to vector<4x256xf32>
    %129 = arith.mulf %117, %128 : vector<4x256xf32>
    %c0_44 = arith.constant 0 : index
    %c0_45 = arith.constant 0 : index
    %130 = vector.load %arg5[%c0_44, %c0_45] : memref<4x1xf32, #tpu.memory_space<vmem>>, vector<4x1xf32>
    %131 = vector.broadcast %130 : vector<4x1xf32> to vector<4x256xf32>
    %132 = arith.mulf %129, %131 : vector<4x256xf32>
    %c0_46 = arith.constant 0 : index
    %c0_47 = arith.constant 0 : index
    %133 = vector.load %arg6[%c0_46, %c0_47] : memref<4x1xf32, #tpu.memory_space<vmem>>, vector<4x1xf32>
    %134 = vector.broadcast %133 : vector<4x1xf32> to vector<4x256xf32>
    %135 = arith.addf %132, %134 : vector<4x256xf32>
    %c0_48 = arith.constant 0 : index
    %c0_49 = arith.constant 0 : index
    %c0_50 = arith.constant 0 : index
    %136 = vector.load %arg7[%c0_48, %c0_49, %c0_50] : memref<1x4x256xf32, #tpu.memory_space<vmem>>, vector<1x4x256xf32>
    %137 = vector.shape_cast %136 : vector<1x4x256xf32> to vector<4x256xf32>
    %138 = vector.shape_cast %135 : vector<4x256xf32> to vector<1x4x256xf32>
    tpu.vector_store %arg7[%c0_48, %c0_49, %c0_50], %138 {strides = array<i32>} : memref<1x4x256xf32, #tpu.memory_space<vmem>>, vector<1x4x256xf32>,
    return
  }
  func.func @transform_0(%arg0: i32) -> (i32, i32, i32) {
    %c0_i32 = arith.constant 0 : i32
    %c0_i32_0 = arith.constant 0 : i32
    %c0_i32_1 = arith.constant 0 : i32
    return %arg0, %c0_i32, %c0_i32_0 : i32, i32, i32
  }
  func.func @transform_1(%arg0: i32) -> (i32, i32) {
    %c0_i32 = arith.constant 0 : i32
    %c0_i32_0 = arith.constant 0 : i32
    %c0_i32_1 = arith.constant 0 : i32
    return %c0_i32, %c0_i32_0 : i32, i32
  }
  func.func @transform_2(%arg0: i32) -> (i32, i32) {
    %c0_i32 = arith.constant 0 : i32
    %c0_i32_0 = arith.constant 0 : i32
    %c0_i32_1 = arith.constant 0 : i32
    return %c0_i32, %c0_i32_0 : i32, i32
  }
  func.func @transform_3(%arg0: i32) -> (i32, i32) {
    %c0_i32 = arith.constant 0 : i32
    %c0_i32_0 = arith.constant 0 : i32
    %c0_i32_1 = arith.constant 0 : i32
    return %c0_i32, %c0_i32_0 : i32, i32
  }
  func.func @transform_4(%arg0: i32) -> (i32, i32) {
    %c0_i32 = arith.constant 0 : i32
    %c0_i32_0 = arith.constant 0 : i32
    %c0_i32_1 = arith.constant 0 : i32
    return %c0_i32, %c0_i32_0 : i32, i32
  }
  func.func @transform_5(%arg0: i32) -> (i32, i32) {
    %c0_i32 = arith.constant 0 : i32
    %c0_i32_0 = arith.constant 0 : i32
    %c0_i32_1 = arith.constant 0 : i32
    return %c0_i32, %c0_i32_0 : i32, i32
  }
  func.func @transform_6(%arg0: i32) -> (i32, i32, i32) {
    %c0_i32 = arith.constant 0 : i32
    %c0_i32_0 = arith.constant 0 : i32
    %c0_i32_1 = arith.constant 0 : i32
    return %arg0, %c0_i32, %c0_i32_0 : i32, i32, i32
  }
}

</mosaic_0001>

<bundles_post_ra>
// kernel: tpu_custom_call.1
= control target key start
LH: loop header
LB: loop body
LE: loop exit
PB: predicated region body
PF: predicated region fallthrough
CT: control target
= control target key end

     0   :  { %11 = vsyncpa [#allocation3], 0  ;;  %s4160_s0 = inlined_call_operand.vmem [shape: f32[2,4,256], index: 0, kind: input, shape index: {}]   ;;  %s4161_s1 = inlined_call_operand.vmem [shape: f32[384,4], index: 1, kind: input, shape index: {}]   ;;  %s4162_s2 = inlined_call_operand.vmem [shape: f32[4,128], index: 2, kind: input, shape index: {}]   ;;  %s4163_s3 = inlined_call_operand.vmem [shape: f32[4,1], index: 3, kind: input, shape index: {}]   ;;  %s4164_s4 = inlined_call_operand.vmem [shape: f32[4,1], index: 4, kind: input, shape index: {}]   ;;  %s4165_s5 = inlined_call_operand.vmem [shape: f32[4,1], index: 5, kind: input, shape index: {}]   ;;  %s4166_s6 = inlined_call_operand.hbm [shape: f32[2,4,256], index: 6, kind: output, shape index: {}]  }
   0x1   :  { %13 = vsyncpa [#allocation3 + $0x1], 0  ;;  %s2938_s21 = smov 0   ;;  %s2940_s22 = smov 0  }
   0x2   :  { %s2942_s23 = smov 0   ;;  %s2944_s24 = smov 0  }
   0x3 LB: > { %s2959_s25 = sadd.s32 4294967295, %s2898_s24   ;;  %s2436_s26 = sadd.s32 4294967294, %s2898_s24   ;;  %s2898_s24 = sphi %s2944_s24, %s4283_s24   ;;  %s2894_s23 = sphi %s2942_s23, %s4282_s23   ;;  %s2890_s22 = sphi %s2940_s22, %s4281_s22   ;;  %s2886_s21 = sphi %s2938_s21, %s4280_s21  }
   0x4   : > { %s2963_s27 = sadd.s32 1, %s2898_s24   ;;  %s157_s28 = sadd.s32 1, %s2894_s23 }
   0x5   : > { %s154_s29 = ssub.s32 %s2898_s24, %s2963_s27  ;;  %p167_p0 = scmp.ne.s32.totalorder %s2894_s23, %s2890_s22 }
   0x6   : > { %p155_p1 = scmp.eq.s32.totalorder %s154_s29, 0  ;;  %p168_p2 = scmp.eq.s32.totalorder %s2959_s25, 1 }
   0x7   : > { %p173_p3 = scmp.ne.s32.totalorder %s2890_s22, %s2886_s21  ;;  %p174_p4 = scmp.eq.s32.totalorder %s2436_s26, 1 }
   0x8   : > { %s2974_s30 = scalar_select %p155_p1, %s2894_s23, %s157_s28  }
   0x9   : > { %p2976_p5 = por %p168_p2, %p167_p0  ;;  %p2980_p6 = por %p174_p4, %p173_p3 }
   0xa   : > { %p2439_p7 = scmp.ge.s32.totalorder %s2898_s24, 1  ;;  %p215_p8 = scmp.lt.s32.totalorder %s2898_s24, 3 }
   0xc   : > { %p216_p9 = pnand %p2439_p7, %p215_p8 }
   0xe   : > { %219 = sbr.rel (%p216_p9) target bundleno = 2850 (0xb22), region = 44 }
  0x15   : > { %p245_p10 = scmp.lt.s32.totalorder %s2959_s25, 1  ;;  %v4167_v0 = vmov 0.0   ;;  %vm446_vm0 = vcmask 1043456   ;;  %v251_v3 = vld [vmem:[%s4161_s1] sm:$0xff]  ;;  %vm301_vm1 = vcmask 31744   ;;  %v252_v4 = vld [vmem:[%s4161_s1 + $0x8] sm:$0xff] }
  0x16   : > { %515 = vmatprep.mubr.f32.mxu0 %v4167_v0  ;;  %773 = vmatprep.mubr.f32.mxu1 %v4167_v0  ;;  %v253_v5 = vld [vmem:[%s4161_s1 + $0x10] sm:$0xff]  ;;  %v254_v6 = vld [vmem:[%s4161_s1 + $0x18] sm:$0xff]  ;;  %v255_v7 = vld [vmem:[%s4161_s1 + $0x20] sm:$0xff]  ;;  %vm1059_vm2 = vcmask 261120   ;;  %s2515_s15 = sshll.u32 %s2959_s25, 7 }
  0x17   : > { %s246_s9 = scalar_select %p245_p10, %s2959_s25, 1  ;;  %v256_v8 = vld [vmem:[%s4161_s1 + $0x28] sm:$0xff]  ;;  %v257_v9 = vld [vmem:[%s4161_s1 + $0x30] sm:$0xff]  ;;  %v258_v10 = vld [vmem:[%s4161_s1 + $0x38] sm:$0xff] }
  0x18   : > { %v259_v11 = vld [vmem:[%s4161_s1 + $0x40] sm:$0xff]  ;;  %v260_v12 = vld [vmem:[%s4161_s1 + $0x48] sm:$0xff]  ;;  %v261_v13 = vld [vmem:[%s4161_s1 + $0x50] sm:$0xff]  ;;  %s4118_s20 = scalar_lea.hbm %s4166_s6, %s2515_s15  ;;  %s2902_s25 = smov [#allocation2]  }
  0x19   : > { %s2514_s10 = sshll.u32 %s246_s9, 3  ;;  %v262_v14 = vld [vmem:[%s4161_s1 + $0x58] sm:$0xff]  ;;  %v263_v15 = vld [vmem:[%s4161_s1 + $0x60] sm:$0xff]  ;;  %v264_v16 = vld [vmem:[%s4161_s1 + $0x68] sm:$0xff]  ;;  %s2840_s29 = sshll.u32 %s2902_s25, 4  ;;  %s2841_s29 = int_to_ptr.vmem [resolvable:$false] %s2840_s29 }
  0x1a   : > { %s249_s13 = scalar_lea.vmem %s4160_s0, %s2514_s10  ;;  %v265_v17 = vld [vmem:[%s4161_s1 + $0x70] sm:$0xff]  ;;  %v266_v18 = vld [vmem:[%s4161_s1 + $0x78] sm:$0xff]  ;;  %v267_v19 = vld [vmem:[%s4161_s1 + $0x80] sm:$0xff]  ;;  %s2842_s9 = scalar_lea.vmem %s2841_s29, 256 }
  0x1b   : > { %v250_v1 = vld [vmem:[%s249_s13] sm:$0xff]  ;;  %v268_v20 = vld [vmem:[%s4161_s1 + $0x88] sm:$0xff]  ;;  %v269_v21 = vld [vmem:[%s4161_s1 + $0x90] sm:$0xff]  ;;  %s242_s13 = sand.u32 1, %s2890_s22  }
  0x1c   : > { %v300_v2 = vcombine.high %v250_v1, %v250_v1  ;;  %v270_v22 = vld [vmem:[%s4161_s1 + $0x98] sm:$0xff]  ;;  %v271_v23 = vld [vmem:[%s4161_s1 + $0xa0] sm:$0xff]  ;;  %v272_v24 = vld [vmem:[%s4161_s1 + $0xa8] sm:$0xff]  ;;  %s2440_s14 = sshll.u32 %s242_s13, 3  ;;  %s2363_s26 = scalar_lea.sflag [#allocation3], %s242_s13 }
  0x1d   : > { %v273_v25 = vld [vmem:[%s4161_s1 + $0xb0] sm:$0xff]  ;;  %v274_v26 = vld [vmem:[%s4161_s1 + $0xb8] sm:$0xff]  ;;  %v275_v27 = vld [vmem:[%s4161_s1 + $0xc0] sm:$0xff]  ;;  %s244_s16 = scalar_lea.vmem [#allocation2], %s2440_s14 }
  0x1e   : > { %2443 = vmatprep.subr.msk.mxu0 %vm446_vm0, %v300_v2  ;;  %2612 = vmatprep.subr.msk.mxu1 %vm446_vm0, %v300_v2  ;;  %v276_v28 = vld [vmem:[%s4161_s1 + $0xc8] sm:$0xff]  ;;  %v277_v29 = vld [vmem:[%s4161_s1 + $0xd0] sm:$0xff]  ;;  %v278_v30 = vld [vmem:[%s4161_s1 + $0xd8] sm:$0xff]  ;;  %s2377_s17 = sshll.u32 %s244_s16, 4  ;;  %s4120_s17 = int_to_ptr.vmem [resolvable:$true] %s2377_s17 }
  0x1f   : > { %2444 = vmatpush1.msk.msra.mxu0 %vm446_vm0, %v250_v1  ;;  %2613 = vmatpush1.msk.msra.mxu1 %vm446_vm0, %v250_v1  ;;  %v279_v31 = vld [vmem:[%s4161_s1 + $0xe0] sm:$0xff]  ;;  %v280_v32 = vld [vmem:[%s4161_s1 + $0xe8] sm:$0xff]  ;;  %v281_v33 = vld [vmem:[%s4161_s1 + $0xf0] sm:$0xff]  ;;  %s2836_s28 = scalar_lea.vmem %s4120_s17, 128  ;;  %p2843_p0 = scmp.lt.s32.totalorder %s4120_s17, %s2841_s29 }
  0x20   : > { %2445 = vmatmul.mubr.msk.f32.vlgmr.msra.gmra.mrb[0].mxu0 %vm301_vm1, %v251_v3  ;;  %v282_v34 = vld [vmem:[%s4161_s1 + $0xf8] sm:$0xff]  ;;  %v283_v35 = vld [vmem:[%s4161_s1 + $0x100] sm:$0xff]  ;;  %v284_v36 = vld [vmem:[%s4161_s1 + $0x108] sm:$0xff]  ;;  %p2837_p11 = scmp.ne.s32.totalorder %s4120_s17, %s2836_s28  ;;  %p2844_p1 = scmp.lt.s32.totalorder %s2842_s9, %s2836_s28 }
  0x21   : > { %521 = vmatprep.mubr.f32.mxu0 %v4167_v0  ;;  %v285_v37 = vld [vmem:[%s4161_s1 + $0x110] sm:$0xff]  ;;  %v286_v38 = vld [vmem:[%s4161_s1 + $0x118] sm:$0xff] }
  0x22   : > { %v294_v44 = vld [vmem:[%s4161_s1 + $0x158] sm:$0xff]  ;;  %p2838_p12 = pnand %p2837_p11, %p2976_p5  ;;  %p2845_p2 = por %p2844_p1, %p2843_p0 }
  0x23   : > { %2488 = vmatmul.mubr.msk.f32.vlgmr.msra.gmra.mrb[0].mxu1 %vm301_vm1, %v294_v44 }
  0x24   : > { %2446 = vmatmul.mubr.msk.f32.gmra.mrb[2].mxu0 %vm301_vm1, %v252_v4  ;;  %779 = vmatprep.mubr.f32.mxu1 %v4167_v0  ;;  %p2839_p13 = pneg %p2838_p12 }
  0x25   : > { %527 = vmatprep.mubr.f32.mxu0 %v4167_v0 }
  0x26   : > { %p2846_p3 = pnand %p2845_p2, %p2839_p13 }
  0x28   : > { %2447 = vmatmul.mubr.msk.f32.gmra.mrb[4].mxu0 %vm301_vm1, %v253_v5 }
  0x29   : > { %533 = vmatprep.mubr.f32.mxu0 %v4167_v0 }
  0x2c   : > { %2448 = vmatmul.mubr.msk.f32.gmra.mrb[6].mxu0 %vm301_vm1, %v254_v6 }
  0x2d   : > { %539 = vmatprep.mubr.f32.mxu0 %v4167_v0 }
  0x30   : > { %2449 = vmatmul.mubr.msk.f32.gmra.mrb[8].mxu0 %vm301_vm1, %v255_v7 }
  0x31   : > { %545 = vmatprep.mubr.f32.mxu0 %v4167_v0 }
  0x34   : > { %2450 = vmatmul.mubr.msk.f32.gmra.mrb[10].mxu0 %vm301_vm1, %v256_v8 }
  0x35   : > { %551 = vmatprep.mubr.f32.mxu0 %v4167_v0 }
  0x38   : > { %2451 = vmatmul.mubr.msk.f32.gmra.mrb[12].mxu0 %vm301_vm1, %v257_v9 }
  0x39   : > { %557 = vmatprep.mubr.f32.mxu0 %v4167_v0 }
  0x3c   : > { %2452 = vmatmul.mubr.msk.f32.gmra.mrb[14].mxu0 %vm301_vm1, %v258_v10 }
  0x3d   : > { %563 = vmatprep.mubr.f32.mxu0 %v4167_v0 }
  0x40   : > { %2453 = vmatmul.mubr.msk.f32.gmra.mrb[16].mxu0 %vm301_vm1, %v259_v11 }
  0x41   : > { %569 = vmatprep.mubr.f32.mxu0 %v4167_v0 }
  0x44   : > { %2454 = vmatmul.mubr.msk.f32.gmra.mrb[18].mxu0 %vm301_vm1, %v260_v12 }
  0x45   : > { %575 = vmatprep.mubr.f32.mxu0 %v4167_v0 }
  0x48   : > { %2455 = vmatmul.mubr.msk.f32.gmra.mrb[20].mxu0 %vm301_vm1, %v261_v13 }
  0x49   : > { %581 = vmatprep.mubr.f32.mxu0 %v4167_v0 }
  0x4c   : > { %2456 = vmatmul.mubr.msk.f32.gmra.mrb[22].mxu0 %vm301_vm1, %v262_v14 }
  0x4d   : > { %587 = vmatprep.mubr.f32.mxu0 %v4167_v0 }
  0x50   : > { %2457 = vmatmul.mubr.msk.f32.gmra.mrb[24].mxu0 %vm301_vm1, %v263_v15 }
  0x51   : > { %593 = vmatprep.mubr.f32.mxu0 %v4167_v0 }
  0x54   : > { %2458 = vmatmul.mubr.msk.f32.gmra.mrb[26].mxu0 %vm301_vm1, %v264_v16 }
  0x55   : > { %599 = vmatprep.mubr.f32.mxu0 %v4167_v0 }
  0x58   : > { %2459 = vmatmul.mubr.msk.f32.gmra.mrb[28].mxu0 %vm301_vm1, %v265_v17 }
  0x59   : > { %605 = vmatprep.mubr.f32.mxu0 %v4167_v0 }
  0x5c   : > { %2460 = vmatmul.mubr.msk.f32.gmra.mrb[30].mxu0 %vm301_vm1, %v266_v18 }
  0x5d   : > { %611 = vmatprep.mubr.f32.mxu0 %v4167_v0 }
  0x60   : > { %2461 = vmatmul.mubr.msk.f32.gmra.mrb[32].mxu0 %vm301_vm1, %v267_v19 }
  0x61   : > { %617 = vmatprep.mubr.f32.mxu0 %v4167_v0 }
  0x64   : > { %2462 = vmatmul.mubr.msk.f32.gmra.mrb[34].mxu0 %vm301_vm1, %v268_v20 }
  0x65   : > { %623 = vmatprep.mubr.f32.mxu0 %v4167_v0 }
  0x68   : > { %2463 = vmatmul.mubr.msk.f32.gmra.mrb[36].mxu0 %vm301_vm1, %v269_v21 }
  0x69   : > { %629 = vmatprep.mubr.f32.mxu0 %v4167_v0 }
  0x6c   : > { %2464 = vmatmul.mubr.msk.f32.gmra.mrb[38].mxu0 %vm301_vm1, %v270_v22 }
  0x6d   : > { %635 = vmatprep.mubr.f32.mxu0 %v4167_v0 }
  0x70   : > { %2465 = vmatmul.mubr.msk.f32.gmra.mrb[40].mxu0 %vm301_vm1, %v271_v23 }
  0x71   : > { %641 = vmatprep.mubr.f32.mxu0 %v4167_v0 }
  0x74   : > { %2466 = vmatmul.mubr.msk.f32.gmra.mrb[42].mxu0 %vm301_vm1, %v272_v24 }
  0x75   : > { %647 = vmatprep.mubr.f32.mxu0 %v4167_v0 }
  0x78   : > { %2467 = vmatmul.mubr.msk.f32.gmra.mrb[44].mxu0 %vm301_vm1, %v273_v25 }
  0x79   : > { %653 = vmatprep.mubr.f32.mxu0 %v4167_v0 }
  0x7c   : > { %2468 = vmatmul.mubr.msk.f32.gmra.mrb[46].mxu0 %vm301_vm1, %v274_v26 }
  0x7d   : > { %659 = vmatprep.mubr.f32.mxu0 %v4167_v0 }
  0x80   : > { %2469 = vmatmul.mubr.msk.f32.gmra.mrb[48].mxu0 %vm301_vm1, %v275_v27 }
  0x81   : > { %665 = vmatprep.mubr.f32.mxu0 %v4167_v0 }
  0x84   : > { %2470 = vmatmul.mubr.msk.f32.gmra.mrb[50].mxu0 %vm301_vm1, %v276_v28 }
  0x85   : > { %671 = vmatprep.mubr.f32.mxu0 %v4167_v0 }
  0x88   : > { %2471 = vmatmul.mubr.msk.f32.gmra.mrb[52].mxu0 %vm301_vm1, %v277_v29 }
  0x89   : > { %677 = vmatprep.mubr.f32.mxu0 %v4167_v0 }
  0x8c   : > { %2472 = vmatmul.mubr.msk.f32.gmra.mrb[54].mxu0 %vm301_vm1, %v278_v30 }
  0x8d   : > { %683 = vmatprep.mubr.f32.mxu0 %v4167_v0 }
  0x90   : > { %2473 = vmatmul.mubr.msk.f32.gmra.mrb[56].mxu0 %vm301_vm1, %v279_v31 }
  0x91   : > { %689 = vmatprep.mubr.f32.mxu0 %v4167_v0 }
  0x94   : > { %2474 = vmatmul.mubr.msk.f32.gmra.mrb[58].mxu0 %vm301_vm1, %v280_v32 }
  0x95   : > { %695 = vmatprep.mubr.f32.mxu0 %v4167_v0 }
  0x98   : > { %2475 = vmatmul.mubr.msk.f32.gmra.mrb[60].mxu0 %vm301_vm1, %v281_v33 }
  0x99   : > { %701 = vmatprep.mubr.f32.mxu0 %v4167_v0 }
  0x9c   : > { %2476 = vmatmul.mubr.msk.f32.gmra.mrb[62].mxu0 %vm301_vm1, %v282_v34 }
  0x9d   : > { %707 = vmatprep.mubr.f32.mxu0 %v4167_v0 }
  0xa0   : > { %2477 = vmatmul.mubr.msk.f32.gmra.mrb[64].mxu0 %vm301_vm1, %v283_v35 }
  0xa1   : > { %713 = vmatprep.mubr.f32.mxu0 %v4167_v0 }
  0xa4   : > { %2478 = vmatmul.mubr.msk.f32.gmra.mrb[66].mxu0 %vm301_vm1, %v284_v36 }
  0xa5   : > { %719 = vmatprep.mubr.f32.mxu0 %v4167_v0 }
  0xa8   : > { %2479 = vmatmul.mubr.msk.f32.gmra.mrb[68].mxu0 %vm301_vm1, %v285_v37 }
  0xa9   : > { %725 = vmatprep.mubr.f32.mxu0 %v4167_v0 }
  0xac   : > { %2480 = vmatmul.mubr.msk.f32.gmra.mrb[70].mxu0 %vm301_vm1, %v286_v38 }
  0xad   : > { %731 = vmatprep.mubr.f32.mxu0 %v4167_v0 }
  0xf3   : > { %v517_v39 = vpop.f32.mrb[0].mxu0 }
  0xf4   : > { %v519_v40 = vpop.f32.mrb[1].mxu0 }
  0xf7   : > { %v523_v41 = vpop.f32.mrb[2].mxu0 }
  0xf8   : > { %v525_v42 = vpop.f32.mrb[3].mxu0 }
  0xfb   : > { %v529_v43 = vpop.f32.mrb[4].mxu0 }
  0xfc   : > { %v804_v45 = vmax.f32 %v517_v39, %v529_v43  ;;  %v531_v46 = vpop.f32.mrb[5].mxu0 }
  0xfd   : > { %v813_v47 = vmax.f32 %v519_v40, %v531_v46 }
  0xff   : > { %v535_v48 = vpop.f32.mrb[6].mxu0 }
 0x100   : > { %v805_v49 = vmax.f32 %v523_v41, %v535_v48  ;;  %v537_v50 = vpop.f32.mrb[7].mxu0 }
 0x101   : > { %v814_v51 = vmax.f32 %v525_v42, %v537_v50 }
 0x102   : > { %v806_v52 = vmax.f32 %v804_v45, %v805_v49 }
 0x103   : > { %v815_v53 = vmax.f32 %v813_v47, %v814_v51  ;;  %v3182_v54 = vpop.f32.mrb[8].mxu0 }
 0x104   : > { %v807_v55 = vrot.slane %v806_v52, 4  ;;  %v3184_v56 = vpop.f32.mrb[9].mxu0 }
 0x105   : > { %v816_v57 = vrot.slane %v815_v53, 4 }
 0x106   : > { %v808_v58 = vmax.f32 %v806_v52, %v807_v55 }
 0x107   : > { %v817_v59 = vmax.f32 %v815_v53, %v816_v57  ;;  %v3186_v60 = vpop.f32.mrb[10].mxu0 }
 0x108   : > { %v809_v61 = vrot.slane %v808_v58, 2  ;;  %v3188_v62 = vpop.f32.mrb[11].mxu0 }
 0x109   : > { %v818_v63 = vrot.slane %v817_v59, 2 }
 0x10a   : > { %v810_v1 = vmax.f32 %v808_v58, %v809_v61 }
 0x10b   : > { %v819_v2 = vmax.f32 %v817_v59, %v818_v63  ;;  %v3190_v3 = vpop.f32.mrb[12].mxu0 }
 0x10c   : > { %v811_v4 = vrot.slane %v810_v1, 1  ;;  %v1161_v5 = vmax.f32 %v3182_v54, %v3190_v3  ;;  %v3194_v6 = vpop.f32.mrb[13].mxu0 }
 0x10d   : > { %v820_v7 = vrot.slane %v819_v2, 1  ;;  %v1170_v8 = vmax.f32 %v3184_v56, %v3194_v6 }
 0x10e   : > { %v812_v9 = vmax.f32 %v810_v1, %v811_v4 }
 0x10f   : > { %v821_v10 = vmax.f32 %v819_v2, %v820_v7  ;;  %v3198_v11 = vpop.f32.mrb[14].mxu0 }
 0x110   : > { %v822_v12 = vsub.f32 %v517_v39, %v812_v9  ;;  %v824_v13 = vsub.f32 %v523_v41, %v812_v9  ;;  %v826_v14 = vsub.f32 %v529_v43, %v812_v9  ;;  %v828_v15 = vsub.f32 %v535_v48, %v812_v9  ;;  %v3200_v16 = vpop.f32.mrb[15].mxu0 }
 0x111   : > { %v823_v17 = vsub.f32 %v519_v40, %v821_v10  ;;  %v825_v18 = vsub.f32 %v525_v42, %v821_v10  ;;  %v827_v19 = vsub.f32 %v531_v46, %v821_v10  ;;  %v829_v20 = vsub.f32 %v537_v50, %v821_v10 }
 0x112   : > { %v830_v21 = vmul.f32 1.442695, %v822_v12  ;;  %v834_v22 = vmul.f32 1.442695, %v824_v13  ;;  %v838_v23 = vmul.f32 1.442695, %v826_v14  ;;  %v1162_v24 = vmax.f32 %v3186_v60, %v3198_v11 }
 0x113   : > { %v842_v25 = vmul.f32 1.442695, %v828_v15  ;;  %v1171_v26 = vmax.f32 %v3188_v62, %v3200_v16  ;;  %v832_v27 = vmul.f32 1.442695, %v823_v17  ;;  %v3206_v29 = vpop.f32.mrb[16].mxu0 }
 0x114   : > { %2658 = vpow2.f32 %v830_v21  ;;  %v1163_v28 = vmax.f32 %v1161_v5, %v1162_v24  ;;  %v836_v30 = vmul.f32 1.442695, %v825_v18  ;;  %v3208_v32 = vpop.f32.mrb[17].mxu0  ;;  %v840_v34 = vmul.f32 1.442695, %v827_v19 }
 0x115   : > { %2660 = vpow2.f32 %v834_v22  ;;  %v1172_v31 = vmax.f32 %v1170_v8, %v1171_v26  ;;  %v844_v39 = vmul.f32 1.442695, %v829_v20 }
 0x116   : > { %2662 = vpow2.f32 %v838_v23  ;;  %v1164_v33 = vrot.slane %v1163_v28, 4 }
 0x117   : > { %2664 = vpow2.f32 %v842_v25  ;;  %v1173_v35 = vrot.slane %v1172_v31, 4  ;;  %v3210_v36 = vpop.f32.mrb[18].mxu0 }
 0x118   : > { %2666 = vpow2.f32 %v832_v27  ;;  %v1165_v37 = vmax.f32 %v1163_v28, %v1164_v33  ;;  %v3212_v38 = vpop.f32.mrb[19].mxu0 }
 0x119   : > { %2668 = vpow2.f32 %v836_v30  ;;  %v1174_v40 = vmax.f32 %v1172_v31, %v1173_v35 }
 0x11a   : > { %v1166_v41 = vrot.slane %v1165_v37, 2  ;;  %2670 = vpow2.f32 %v840_v34 }
 0x11b   : > { %v1175_v42 = vrot.slane %v1174_v40, 2  ;;  %v3214_v43 = vpop.f32.mrb[20].mxu0  ;;  %2672 = vpow2.f32 %v844_v39 }
 0x11c   : > { %v1167_v44 = vmax.f32 %v1165_v37, %v1166_v41  ;;  %v1517_v45 = vmax.f32 %v3206_v29, %v3214_v43  ;;  %v3218_v46 = vpop.f32.mrb[21].mxu0 }
 0x11d   : > { %v1176_v47 = vmax.f32 %v1174_v40, %v1175_v42  ;;  %v1526_v48 = vmax.f32 %v3208_v32, %v3218_v46 }
 0x11e   : > { %v3222_v49 = vpop.eup %2658  ;;  %v1168_v50 = vrot.slane %v1167_v44, 1 }
 0x11f   : > { %v3224_v51 = vpop.eup %2660  ;;  %v1177_v52 = vrot.slane %v1176_v47, 1  ;;  %v3226_v53 = vpop.f32.mrb[22].mxu0 }
 0x120   : > { %v3228_v55 = vpop.eup %2662  ;;  %v846_v57 = vadd.f32 %v3224_v51, %v3222_v49  ;;  %v1169_v58 = vmax.f32 %v1167_v44, %v1168_v50  ;;  %v1518_v59 = vmax.f32 %v3210_v36, %v3226_v53  ;;  %v3234_v61 = vpop.f32.mrb[23].mxu0 }
 0x121   : > { %v3236_v63 = vpop.eup %2664  ;;  %v1178_v1 = vmax.f32 %v1176_v47, %v1177_v52  ;;  %v1527_v2 = vmax.f32 %v3212_v38, %v3234_v61 }
 0x122   : > { %v3240_v4 = vpop.eup %2666  ;;  %v847_v5 = vadd.f32 %v3228_v55, %v846_v57  ;;  %v1179_v7 = vsub.f32 %v3182_v54, %v1169_v58  ;;  %v1181_v8 = vsub.f32 %v3186_v60, %v1169_v58  ;;  %v1183_v9 = vsub.f32 %v3190_v3, %v1169_v58 }
 0x123   : > { %v3246_v10 = vpop.eup %2668  ;;  %v1185_v12 = vsub.f32 %v3198_v11, %v1169_v58  ;;  %v1180_v13 = vsub.f32 %v3184_v56, %v1178_v1  ;;  %v1182_v14 = vsub.f32 %v3188_v62, %v1178_v1  ;;  %v1184_v15 = vsub.f32 %v3194_v6, %v1178_v1  ;;  %v3252_v17 = vpop.f32.mrb[24].mxu0 }
 0x124   : > { %v848_v18 = vadd.f32 %v3236_v63, %v847_v5  ;;  %v855_v54 = vadd.f32 %v3246_v10, %v3240_v4  ;;  %v1187_v60 = vmul.f32 1.442695, %v1179_v7  ;;  %v1191_v19 = vmul.f32 1.442695, %v1181_v8  ;;  %v3257_v3 = vpop.f32.mrb[25].mxu0  ;;  %v3259_v20 = vpop.eup %2670 }
 0x125   : > { %v1195_v11 = vmul.f32 1.442695, %v1183_v9  ;;  %v1199_v21 = vmul.f32 1.442695, %v1185_v12  ;;  %v1186_v56 = vsub.f32 %v3200_v16, %v1178_v1  ;;  %v1189_v22 = vmul.f32 1.442695, %v1180_v13  ;;  %v3263_v23 = vpop.eup %2672 }
 0x126   : > { %v849_v62 = vrot.slane %v848_v18, 4  ;;  %v856_v6 = vadd.f32 %v3259_v20, %v855_v54  ;;  %2674 = vpow2.f32 %v1187_v60  ;;  %v1193_v24 = vmul.f32 1.442695, %v1182_v14 }
 0x127   : > { %2676 = vpow2.f32 %v1191_v19  ;;  %v1519_v25 = vmax.f32 %v1517_v45, %v1518_v59  ;;  %v3265_v26 = vpop.f32.mrb[26].mxu0  ;;  %v1528_v30 = vmax.f32 %v1526_v48, %v1527_v2  ;;  %v1197_v16 = vmul.f32 1.442695, %v1184_v15 }
 0x128   : > { %v850_v27 = vadd.f32 %v849_v62, %v848_v18  ;;  %v857_v28 = vadd.f32 %v3263_v23, %v856_v6  ;;  %2678 = vpow2.f32 %v1195_v11  ;;  %v3268_v31 = vpop.f32.mrb[27].mxu0  ;;  %v1201_v39 = vmul.f32 1.442695, %v1186_v56 }
 0x129   : > { %2680 = vpow2.f32 %v1199_v21  ;;  %v1520_v33 = vrot.slane %v1519_v25, 4  ;;  %v1529_v37 = vrot.slane %v1528_v30, 4 }
 0x12a   : > { %v851_v34 = vrot.slane %v850_v27, 2  ;;  %v858_v35 = vrot.slane %v857_v28, 4  ;;  %2682 = vpow2.f32 %v1189_v22 }
 0x12b   : > { %2684 = vpow2.f32 %v1193_v24  ;;  %v1521_v40 = vmax.f32 %v1519_v25, %v1520_v33  ;;  %v3270_v41 = vpop.f32.mrb[28].mxu0  ;;  %v1530_v45 = vmax.f32 %v1528_v30, %v1529_v37 }
 0x12c   : > { %v852_v42 = vadd.f32 %v851_v34, %v850_v27  ;;  %v859_v44 = vadd.f32 %v858_v35, %v857_v28  ;;  %v3272_v47 = vpop.f32.mrb[29].mxu0  ;;  %2686 = vpow2.f32 %v1197_v16  ;;  %v1873_v50 = vmax.f32 %v3252_v17, %v3270_v41 }
 0x12d   : > { %v1522_v48 = vrot.slane %v1521_v40, 2  ;;  %v1882_v52 = vmax.f32 %v3257_v3, %v3272_v47  ;;  %v1531_v59 = vrot.slane %v1530_v45, 2  ;;  %2688 = vpow2.f32 %v1201_v39 }
 0x12e   : > { %v853_v57 = vrot.slane %v852_v42, 1  ;;  %v860_v58 = vrot.slane %v859_v44, 2 }
 0x12f   : > { %v1523_v1 = vmax.f32 %v1521_v40, %v1522_v48  ;;  %v3278_v2 = vpop.f32.mrb[30].mxu0  ;;  %v1532_v9 = vmax.f32 %v1530_v45, %v1531_v59 }
 0x130   : > { %v3280_v5 = vpop.eup %2674  ;;  %v854_v7 = vadd.f32 %v853_v57, %v852_v42  ;;  %v861_v8 = vadd.f32 %v860_v58, %v859_v44  ;;  %v1874_v12 = vmax.f32 %v3265_v26, %v3278_v2  ;;  %v3284_v13 = vpop.f32.mrb[31].mxu0 }
 0x131   : > { %v3286_v14 = vpop.eup %2676  ;;  %v1524_v15 = vrot.slane %v1523_v1, 1  ;;  %v1883_v18 = vmax.f32 %v3268_v31, %v3284_v13  ;;  %v1533_v11 = vrot.slane %v1532_v9, 1 }
 0x132   : > { %v3290_v54 = vpop.eup %2678  ;;  %2690 = vrcp.f32 %v854_v7  ;;  %v862_v60 = vrot.slane %v861_v8, 1  ;;  %v1203_v19 = vadd.f32 %v3286_v14, %v3280_v5  ;;  %v1875_v62 = vmax.f32 %v1873_v50, %v1874_v12 }
 0x133   : > { %v3294_v21 = vpop.eup %2680  ;;  %v1525_v56 = vmax.f32 %v1523_v1, %v1524_v15  ;;  %v1884_v6 = vmax.f32 %v1882_v52, %v1883_v18  ;;  %v3296_v22 = vpop.f32.mrb[32].mxu0  ;;  %v1534_v28 = vmax.f32 %v1532_v9, %v1533_v11 }
 0x134   : > { %v3298_v24 = vpop.eup %2682  ;;  %v863_v25 = vadd.f32 %v862_v60, %v861_v8  ;;  %v1204_v27 = vadd.f32 %v3290_v54, %v1203_v19  ;;  %v3301_v30 = vpop.f32.mrb[33].mxu0  ;;  %v1876_v15 = vrot.slane %v1875_v62, 4 }
 0x135   : > { %v3303_v16 = vpop.eup %2684  ;;  %v1535_v33 = vsub.f32 %v3206_v29, %v1525_v56  ;;  %v1537_v34 = vsub.f32 %v3210_v36, %v1525_v56  ;;  %v1539_v35 = vsub.f32 %v3214_v43, %v1525_v56  ;;  %v1541_v37 = vsub.f32 %v3226_v53, %v1525_v56 }
 0x136   : > { %2692 = vrcp.f32 %v863_v25  ;;  %v1205_v39 = vadd.f32 %v3294_v21, %v1204_v27  ;;  %v1212_v40 = vadd.f32 %v3303_v16, %v3298_v24  ;;  %v1536_v42 = vsub.f32 %v3208_v32, %v1534_v28  ;;  %v3313_v44 = vpop.eup %2686 }
 0x137   : > { %v1543_v45 = vmul.f32 1.442695, %v1535_v33  ;;  %v1547_v48 = vmul.f32 1.442695, %v1537_v34  ;;  %v1551_v50 = vmul.f32 1.442695, %v1539_v35  ;;  %v1538_v29 = vsub.f32 %v3212_v38, %v1534_v28  ;;  %v3320_v58 = vpop.eup %2688 }
 0x138   : > { %v1206_v36 = vrot.slane %v1205_v39, 4  ;;  %v1213_v43 = vadd.f32 %v3313_v44, %v1212_v40  ;;  %v1555_v52 = vmul.f32 1.442695, %v1541_v37  ;;  %v1540_v53 = vsub.f32 %v3218_v46, %v1534_v28  ;;  %v3318_v57 = vpop.f32.mrb[34].mxu0 }
 0x139   : > { %2694 = vpow2.f32 %v1543_v45  ;;  %v1542_v32 = vsub.f32 %v3234_v61, %v1534_v28  ;;  %v1545_v59 = vmul.f32 1.442695, %v1536_v42  ;;  %v1549_v1 = vmul.f32 1.442695, %v1538_v29  ;;  %v3323_v7 = vpop.f32.mrb[35].mxu0 }
 0x13a   : > { %v1207_v8 = vadd.f32 %v1206_v36, %v1205_v39  ;;  %v1214_v38 = vadd.f32 %v3320_v58, %v1213_v43  ;;  %2696 = vpow2.f32 %v1547_v48  ;;  %v1553_v9 = vmul.f32 1.442695, %v1540_v53 }
 0x13b   : > { %2698 = vpow2.f32 %v1551_v50  ;;  %v1557_v12 = vmul.f32 1.442695, %v1542_v32  ;;  %v1885_v46 = vrot.slane %v1884_v6, 4  ;;  %v3326_v18 = vpop.f32.mrb[36].mxu0  ;;  %v882_v61 = vmax.f32 %v3296_v22, %v3301_v30 }
 0x13c   : > { %v3328_v60 = vpop.eup %2690  ;;  %v1208_v19 = vrot.slane %v1207_v8, 2  ;;  %v1215_v11 = vrot.slane %v1214_v38, 4  ;;  %2700 = vpow2.f32 %v1555_v52  ;;  %v3332_v56 = vpop.f32.mrb[37].mxu0  ;;  %v1877_v25 = vmax.f32 %v1875_v62, %v1876_v15 }
 0x13d   : > { %2702 = vpow2.f32 %v1545_v59  ;;  %v1886_v27 = vmax.f32 %v1884_v6, %v1885_v46  ;;  %v885_v28 = vmax.f32 %v3318_v57, %v3323_v7  ;;  %883 = vmax.xlane.f32.xlu0 %v882_v61  ;;  %v888_v35 = vmax.f32 %v3326_v18, %v3332_v56 }
 0x13e   : > { %v1209_v33 = vadd.f32 %v1208_v19, %v1207_v8  ;;  %v1216_v34 = vadd.f32 %v1215_v11, %v1214_v38  ;;  %2704 = vpow2.f32 %v1549_v1  ;;  %v1878_v37 = vrot.slane %v1877_v25, 2 }
 0x13f   : > { %2706 = vpow2.f32 %v1553_v9  ;;  %v1887_v39 = vrot.slane %v1886_v27, 2  ;;  %v3338_v40 = vpop.f32.mrb[38].mxu0  ;;  %v865_v42 = vmul.f32 %v3328_v60, %v3222_v49  ;;  %889 = vmax.xlane.f32.xlu1 %v888_v35  ;;  %v868_v50 = vmul.f32 %v3328_v60, %v3224_v51 }
 0x140   : > { %v2693_v62 = vpop.eup %2692  ;;  %v1210_v6 = vrot.slane %v1209_v33, 1  ;;  %v1217_v45 = vrot.slane %v1216_v34, 2  ;;  %2708 = vpow2.f32 %v1557_v12  ;;  %v3342_v48 = vpop.f32.mrb[39].mxu0  ;;  %v1879_v29 = vmax.f32 %v1877_v25, %v1878_v37 }
 0x141   : > { %v1888_v36 = vmax.f32 %v1886_v27, %v1887_v39  ;;  %v891_v43 = vmax.f32 %v3338_v40, %v3342_v48  ;;  %v867_v52 = vmul.f32 %v2693_v62, %v3240_v4  ;;  %886 = vmax.xlane.f32.xlu0 %v885_v28  ;;  %v869_v49 = vmul.f32 %v2693_v62, %v3246_v10 }
 0x142   : > { %v1211_v53 = vadd.f32 %v1210_v6, %v1209_v33  ;;  %v1218_v32 = vadd.f32 %v1217_v45, %v1216_v34  ;;  %v3350_v59 = vmul.f32 0.17677669, %v865_v42  ;;  %v1880_v8 = vrot.slane %v1879_v29, 1 }
 0x143   : > { %v3352_v1 = vpop.eup %2694  ;;  %v1889_v38 = vrot.slane %v1888_v36, 1  ;;  %v3354_v9 = vpop.f32.mrb[40].mxu0  ;;  %v3356_v51 = vmul.f32 0.17677669, %v867_v52  ;;  %v871_v12 = vmul.f32 %v2693_v62, %v3259_v20  ;;  %892 = vmax.xlane.f32.xlu1 %v891_v43  ;;  %v3363_v10 = vmul.f32 0.17677669, %v869_v49 }
 0x144   : > { %v3359_v15 = vpop.eup %2696  ;;  %2710 = vrcp.f32 %v1211_v53  ;;  %v1219_v4 = vrot.slane %v1218_v32, 1  ;;  %v3361_v46 = vpop.f32.mrb[41].mxu0  ;;  %v3365_v19 = vmul.f32 0.17677669, %v868_v50  ;;  %v1881_v25 = vmax.f32 %v1879_v29, %v1880_v8 }
 0x145   : > { %v3367_v11 = vpop.eup %2698  ;;  %v1559_v61 = vadd.f32 %v3359_v15, %v3352_v1  ;;  %v1890_v27 = vmax.f32 %v1888_v36, %v1889_v38  ;;  %v873_v20 = vmul.f32 %v2693_v62, %v3263_v23  ;;  %v3378_v37 = vmul.f32 0.17677669, %v871_v12 }
 0x146   : > { %v3372_v28 = vpop.eup %2700  ;;  %v1220_v33 = vadd.f32 %v1219_v4, %v1218_v32  ;;  %v1891_v6 = vsub.f32 %v3252_v17, %v1881_v25  ;;  %v1893_v45 = vsub.f32 %v3265_v26, %v1881_v25  ;;  %v1895_v23 = vsub.f32 %v3270_v41, %v1881_v25 }
 0x147   : > { %v3380_v39 = vpop.eup %2702  ;;  %v1560_v42 = vadd.f32 %v3367_v11, %v1559_v61  ;;  %v3386_v62 = vpop.f32.mrb[42].mxu0  ;;  %v1897_v29 = vsub.f32 %v3278_v2, %v1881_v25  ;;  %v1892_v36 = vsub.f32 %v3257_v3, %v1890_v27  ;;  %v1894_v43 = vsub.f32 %v3268_v31, %v1890_v27 }
 0x148   : > { %v3388_v50 = vpop.eup %2704  ;;  %2712 = vrcp.f32 %v1220_v33  ;;  %v3393_v52 = vpop.f32.mrb[43].mxu0  ;;  %v1899_v41 = vmul.f32 1.442695, %v1891_v6  ;;  %v1903_v32 = vmul.f32 1.442695, %v1893_v45  ;;  %v1896_v2 = vsub.f32 %v3272_v47, %v1890_v27 }
 0x149   : > { %v3395_v53 = vpop.eup %2706  ;;  %v1561_v17 = vadd.f32 %v3372_v28, %v1560_v42  ;;  %v1568_v26 = vadd.f32 %v3388_v50, %v3380_v39  ;;  %v1907_v8 = vmul.f32 1.442695, %v1895_v23  ;;  %v1911_v38 = vmul.f32 1.442695, %v1897_v29 }
 0x14a   : > { %v3400_v49 = vpop.eup %2708  ;;  %v1898_v3 = vsub.f32 %v3284_v13, %v1890_v27  ;;  %2714 = vpow2.f32 %v1899_v41  ;;  %v1901_v4 = vmul.f32 1.442695, %v1892_v36  ;;  %v1905_v25 = vmul.f32 1.442695, %v1894_v43 }
 0x14b   : > { %v1562_v31 = vrot.slane %v1561_v17, 4  ;;  %v1569_v12 = vadd.f32 %v3395_v53, %v1568_v26  ;;  %v3405_v61 = vpop.f32.mrb[44].mxu0  ;;  %2716 = vpow2.f32 %v1903_v32  ;;  %v1909_v33 = vmul.f32 1.442695, %v1896_v2 }
 0x14c   : > { %2718 = vpow2.f32 %v1907_v8  ;;  %v3408_v45 = vpop.f32.mrb[45].mxu0  ;;  %v3410_v23 = vmul.f32 0.17677669, %v873_v20  ;;  %v1913_v13 = vmul.f32 1.442695, %v1898_v3  ;;  %v870_v27 = vmul.f32 %v3328_v60, %v3228_v55 }
 0x14d   : > { %v1563_v42 = vadd.f32 %v1562_v31, %v1561_v17  ;;  %v1570_v6 = vadd.f32 %v3400_v49, %v1569_v12  ;;  %2720 = vpow2.f32 %v1911_v38  ;;  %v872_v29 = vmul.f32 %v3328_v60, %v3236_v63 }
 0x14e   : > { %v2711_v47 = vpop.eup %2710  ;;  %2722 = vpow2.f32 %v1901_v4  ;;  %v3422_v41 = vmul.f32 0.17677669, %v870_v27 }
 0x14f   : > { %v1564_v36 = vrot.slane %v1563_v42, 2  ;;  %v1571_v43 = vrot.slane %v1570_v6, 4  ;;  %v3416_v17 = vpop.f32.mrb[46].mxu0  ;;  %2724 = vpow2.f32 %v1905_v25  ;;  %v3424_v32 = vmul.f32 0.17677669, %v872_v29 }
 0x150   : > { %v3420_v20 = vpop.f32.mrb[47].mxu0  ;;  %4195 = vst [vmem:[#allocation5_spill] sm:$0xff] %v3422_v41  ;;  %v1222_v55 = vmul.f32 %v2711_v47, %v3280_v5  ;;  %2726 = vpow2.f32 %v1909_v33  ;;  %v1225_v63 = vmul.f32 %v2711_v47, %v3286_v14  ;;  %v1227_v31 = vmul.f32 %v2711_v47, %v3290_v54 }
 0x151   : > { %4196 = vst [vmem:[#allocation6_spill] sm:$0xff] %v3424_v32  ;;  %v1565_v8 = vadd.f32 %v1564_v36, %v1563_v42  ;;  %v1572_v38 = vadd.f32 %v1571_v43, %v1570_v6  ;;  %2728 = vpow2.f32 %v1913_v13  ;;  %v1229_v27 = vmul.f32 %v2711_v47, %v3294_v21 }
 0x152   : > { %v2713_v60 = vpop.eup %2712  ;;  %v3430_v3 = vmul.f32 0.17677669, %v1222_v55  ;;  %v3439_v14 = vmul.f32 0.17677669, %v1225_v63 }
 0x153   : > { %v1566_v12 = vrot.slane %v1565_v8, 1  ;;  %v1573_v4 = vrot.slane %v1572_v38, 2  ;;  %v3433_v25 = vpop.f32.mrb[48].mxu0  ;;  %v1224_v5 = vmul.f32 %v2713_v60, %v3298_v24  ;;  %v1226_v42 = vmul.f32 %v2713_v60, %v3303_v16 }
 0x154   : > { %4197 = vst [vmem:[#allocation7_spill] sm:$0xff] %v3430_v3  ;;  %v3437_v33 = vpop.f32.mrb[49].mxu0  ;;  %4198 = vst [vmem:[#allocation8_spill] sm:$0xff] %v3439_v14  ;;  %v1228_v6 = vmul.f32 %v2713_v60, %v3313_v44  ;;  %v1230_v13 = vmul.f32 %v2713_v60, %v3320_v58  ;;  %v3444_v29 = vpop.eup %2714  ;;  %v3458_v58 = vmul.f32 0.17677669, %v1227_v31 }
 0x155   : > { %v1567_v54 = vadd.f32 %v1566_v12, %v1565_v8  ;;  %v1574_v36 = vadd.f32 %v1573_v4, %v1572_v38  ;;  %v3446_v43 = vmul.f32 0.17677669, %v1224_v5  ;;  %v3448_v55 = vmul.f32 0.17677669, %v1226_v42  ;;  %v3450_v24 = vpop.eup %2716 }
 0x156   : > { %v3454_v63 = vmul.f32 0.17677669, %v1228_v6  ;;  %v3456_v44 = vmul.f32 0.17677669, %v1230_v13  ;;  %4203 = vst [vmem:[#allocation13_spill] sm:$0xff] %v3458_v58  ;;  %v3460_v21 = vpop.eup %2718  ;;  %v1915_v8 = vadd.f32 %v3450_v24, %v3444_v29 }
 0x157   : > { %4199 = vst [vmem:[#allocation9_spill] sm:$0xff] %v3446_v43  ;;  %4200 = vst [vmem:[#allocation10_spill] sm:$0xff] %v3448_v55  ;;  %2730 = vrcp.f32 %v1567_v54  ;;  %v1575_v47 = vrot.slane %v1574_v36, 1  ;;  %v3464_v38 = vpop.f32.mrb[50].mxu0  ;;  %v3468_v12 = vpop.eup %2720  ;;  %v3474_v5 = vmul.f32 0.17677669, %v1229_v27 }
 0x158   : > { %4201 = vst [vmem:[#allocation11_spill] sm:$0xff] %v3454_v63  ;;  %4202 = vst [vmem:[#allocation12_spill] sm:$0xff] %v3456_v44  ;;  %v3470_v4 = vpop.f32.mrb[51].mxu0  ;;  %v3476_v42 = vpop.eup %2722  ;;  %v1916_v13 = vadd.f32 %v3460_v21, %v1915_v8 }
 0x159   : > { %4204 = vst [vmem:[#allocation14_spill] sm:$0xff] %v3474_v5  ;;  %v1576_v6 = vadd.f32 %v1575_v47, %v1574_v36  ;;  %v3479_v54 = vpop.eup %2724 }
 0x15a   : > { %v3483_v60 = vpop.eup %2726  ;;  %v1917_v2 = vadd.f32 %v3468_v12, %v1916_v13  ;;  %v1924_v31 = vadd.f32 %v3479_v54, %v3476_v42 }
 0x15b   : > { %2732 = vrcp.f32 %v1576_v6  ;;  %v3488_v27 = vpop.f32.mrb[52].mxu0  ;;  %v3490_v26 = vpop.eup %2728 }
 0x15c   : > { %v3492_v36 = vpop.f32.mrb[53].mxu0  ;;  %v1918_v47 = vrot.slane %v1917_v2, 4  ;;  %v1925_v8 = vadd.f32 %v3483_v60, %v1924_v31 }
 0x15e   : > { %v1919_v35 = vadd.f32 %v1918_v47, %v1917_v2  ;;  %v1926_v16 = vadd.f32 %v3490_v26, %v1925_v8 }
 0x15f   : > { %v3496_v34 = vpop.f32.mrb[54].mxu0 }
 0x160   : > { %v3498_v6 = vpop.f32.mrb[55].mxu0  ;;  %v1920_v0 = vrot.slane %v1919_v35, 2  ;;  %v1927_v58 = vrot.slane %v1926_v16, 4 }
 0x161   : > { %v2731_v13 = vpop.eup %2730 }
 0x162   : > { %v1578_v5 = vmul.f32 %v2731_v13, %v3352_v1  ;;  %v1581_v63 = vmul.f32 %v2731_v13, %v3359_v15  ;;  %v1583_v44 = vmul.f32 %v2731_v13, %v3367_v11  ;;  %v1585_v3 = vmul.f32 %v2731_v13, %v3372_v28 }
 0x163   : > { %v1921_v14 = vadd.f32 %v1920_v0, %v1919_v35  ;;  %v1928_v31 = vadd.f32 %v1927_v58, %v1926_v16  ;;  %v3504_v2 = vpop.f32.mrb[56].mxu0 }
 0x164   : > { %v3506_v47 = vpop.f32.mrb[57].mxu0  ;;  %v3508_v8 = vmul.f32 0.17677669, %v1578_v5  ;;  %v3510_v43 = vmul.f32 0.17677669, %v1581_v63 }
 0x165   : > { %v2733_v55 = vpop.eup %2732  ;;  %v1922_v41 = vrot.slane %v1921_v14, 1  ;;  %v1929_v32 = vrot.slane %v1928_v31, 2  ;;  %v3512_v1 = vmul.f32 0.17677669, %v1583_v44  ;;  %v3514_v15 = vmul.f32 0.17677669, %v1585_v3 }
 0x166   : > { %4205 = vst [vmem:[#allocation15_spill] sm:$0xff] %v3508_v8  ;;  %4206 = vst [vmem:[#allocation16_spill] sm:$0xff] %v3510_v43  ;;  %v1580_v28 = vmul.f32 %v2733_v55, %v3380_v39  ;;  %v1582_v35 = vmul.f32 %v2733_v55, %v3388_v50  ;;  %v1584_v3 = vmul.f32 %v2733_v55, %v3395_v53 }
 0x167   : > { %4207 = vst [vmem:[#allocation17_spill] sm:$0xff] %v3512_v1  ;;  %4208 = vst [vmem:[#allocation18_spill] sm:$0xff] %v3514_v15  ;;  %v1923_v16 = vadd.f32 %v1922_v41, %v1921_v14  ;;  %v1930_v63 = vadd.f32 %v1929_v32, %v1928_v31  ;;  %v3522_v58 = vpop.f32.mrb[58].mxu0  ;;  %v1586_v0 = vmul.f32 %v2733_v55, %v3400_v49  ;;  %v289_v14 = vld [vmem:[%s4161_s1 + $0x130] sm:$0xff] }
 0x168   : > { %v3527_v5 = vpop.f32.mrb[59].mxu0  ;;  %v3529_v13 = vmul.f32 0.17677669, %v1580_v28  ;;  %v3531_v11 = vmul.f32 0.17677669, %v1582_v35 }
 0x169   : > { %2734 = vrcp.f32 %v1923_v16  ;;  %v1931_v50 = vrot.slane %v1930_v63, 1  ;;  %v3536_v41 = vmul.f32 0.17677669, %v1584_v3  ;;  %v3544_v31 = vmul.f32 0.17677669, %v1586_v0  ;;  %v287_v16 = vld [vmem:[%s4161_s1 + $0x120] sm:$0xff] }
 0x16a   : > { %2481 = vmatmul.mubr.msk.f32.gmra.mrb[72].mxu0 %vm301_vm1, %v287_v16  ;;  %v4211_v0 = vmov 0.0  }
 0x16b   : > { %4209 = vst [vmem:[#allocation19_spill] sm:$0xff] %v3536_v41  ;;  %4210 = vst [vmem:[#allocation20_spill] sm:$0xff] %v3544_v31  ;;  %v1932_v28 = vadd.f32 %v1931_v50, %v1930_v63  ;;  %v3546_v49 = vpop.f32.mrb[60].mxu0  ;;  %737 = vmatprep.mubr.f32.mxu0 %v4211_v0  ;;  %v288_v63 = vld [vmem:[%s4161_s1 + $0x128] sm:$0xff]  ;;  %v295_v50 = vld [vmem:[%s4161_s1 + $0x160] sm:$0xff] }
 0x16c   : > { %v3548_v55 = vpop.f32.mrb[61].mxu0  ;;  %2489 = vmatmul.mubr.msk.f32.gmra.mrb[2].mxu1 %vm301_vm1, %v295_v50 }
 0x16d   : > { %2736 = vrcp.f32 %v1932_v28  ;;  %785 = vmatprep.mubr.f32.mxu1 %v4211_v0  ;;  %v296_v28 = vld [vmem:[%s4161_s1 + $0x168] sm:$0xff] }
 0x16e   : > { %2482 = vmatmul.mubr.msk.f32.gmra.mrb[74].mxu0 %vm301_vm1, %v288_v63 }
 0x16f   : > { %v3555_v3 = vpop.f32.mrb[62].mxu0  ;;  %743 = vmatprep.mubr.f32.mxu0 %v4211_v0 }
 0x170   : > { %v3558_v39 = vpop.f32.mrb[63].mxu0  ;;  %2490 = vmatmul.mubr.msk.f32.gmra.mrb[4].mxu1 %vm301_vm1, %v296_v28 }
 0x171   : > { %791 = vmatprep.mubr.f32.mxu1 %v4211_v0 }
 0x172   : > { %2483 = vmatmul.mubr.msk.f32.gmra.mrb[76].mxu0 %vm301_vm1, %v289_v14 }
 0x173   : > { %v2735_v16 = vpop.eup %2734  ;;  %v709_v35 = vpop.f32.mrb[64].mxu0  ;;  %749 = vmatprep.mubr.f32.mxu0 %v4211_v0 }
 0x174   : > { %v711_v44 = vpop.f32.mrb[65].mxu0  ;;  %v1934_v53 = vmul.f32 %v2735_v16, %v3444_v29  ;;  %v1937_v50 = vmul.f32 %v2735_v16, %v3450_v24  ;;  %v1939_v32 = vmul.f32 %v2735_v16, %v3460_v21  ;;  %v1941_v1 = vmul.f32 %v2735_v16, %v3468_v12  ;;  %v290_v12 = vld [vmem:[%s4161_s1 + $0x138] sm:$0xff] }
 0x176   : > { %v3583_v63 = vmul.f32 0.17677669, %v1934_v53  ;;  %v3585_v15 = vmul.f32 0.17677669, %v1937_v50  ;;  %v3587_v41 = vmul.f32 0.17677669, %v1939_v32  ;;  %2484 = vmatmul.mubr.msk.f32.gmra.mrb[78].mxu0 %vm301_vm1, %v290_v12 }
 0x177   : > { %v2737_v31 = vpop.eup %2736  ;;  %v715_v8 = vpop.f32.mrb[66].mxu0  ;;  %v3590_v29 = vmul.f32 0.17677669, %v1941_v1  ;;  %755 = vmatprep.mubr.f32.mxu0 %v4211_v0 }
 0x178   : > { %4212 = vst [vmem:[#allocation21_spill] sm:$0xff] %v3583_v63  ;;  %4213 = vst [vmem:[#allocation22_spill] sm:$0xff] %v3585_v15  ;;  %v2518_v24 = vpack.c.bf16 %v715_v8, %v709_v35  ;;  %v717_v21 = vpop.f32.mrb[67].mxu0  ;;  %v1936_v53 = vmul.f32 %v2737_v31, %v3476_v42  ;;  %v1938_v28 = vmul.f32 %v2737_v31, %v3479_v54 }
 0x179   : > { %4214 = vst [vmem:[#allocation23_spill] sm:$0xff] %v3587_v41  ;;  %4215 = vst [vmem:[#allocation24_spill] sm:$0xff] %v3590_v29  ;;  %v2516_v16 = vpack.c.bf16 %v717_v21, %v711_v44  ;;  %v1940_v14 = vmul.f32 %v2737_v31, %v3483_v60  ;;  %v1942_v1 = vmul.f32 %v2737_v31, %v3490_v26  ;;  %v291_v26 = vld [vmem:[%s4161_s1 + $0x140] sm:$0xff] }
 0x17a   : > { %v3604_v35 = vmul.f32 0.17677669, %v1936_v53  ;;  %v3606_v50 = vmul.f32 0.17677669, %v1938_v28  ;;  %2485 = vmatmul.mubr.msk.f32.gmra.mrb[80].mxu0 %vm301_vm1, %v291_v26 }
 0x17b   : > { %2517 = vmatprep.subr.bf16.mxu1 %v2516_v16  ;;  %v721_v43 = vpop.f32.mrb[68].mxu0  ;;  %v3609_v42 = vmul.f32 0.17677669, %v1940_v14  ;;  %v3611_v54 = vmul.f32 0.17677669, %v1942_v1  ;;  %761 = vmatprep.mubr.f32.mxu0 %v4211_v0  ;;  %v293_v16 = vld [vmem:[%s4161_s1 + $0x150] sm:$0xff] }
 0x17c   : > { %4216 = vst [vmem:[#allocation25_spill] sm:$0xff] %v3604_v35  ;;  %4217 = vst [vmem:[#allocation26_spill] sm:$0xff] %v3606_v50  ;;  %2519 = vmatpush1.bf16.xpose.msra.mxu1 %v2518_v24  ;;  %v723_v44 = vpop.f32.mrb[69].mxu0  ;;  %v292_v24 = vld [vmem:[%s4161_s1 + $0x148] sm:$0xff] }
 0x17d   : > { %4218 = vst [vmem:[#allocation27_spill] sm:$0xff] %v3609_v42  ;;  %4219 = vst [vmem:[#allocation28_spill] sm:$0xff] %v3611_v54 }
 0x17e   : > { %2486 = vmatmul.mubr.msk.f32.gmra.mrb[82].mxu0 %vm301_vm1, %v292_v24 }
 0x17f   : > { %v727_v21 = vpop.f32.mrb[70].mxu0  ;;  %767 = vmatprep.mubr.f32.mxu0 %v4211_v0 }
 0x180   : > { %v2522_v12 = vpack.c.bf16 %v727_v21, %v721_v43  ;;  %v729_v53 = vpop.f32.mrb[71].mxu0  ;;  %v4220_v43 = vpack.c.bf16 %v3363_v10, %v3356_v51  ;;  %v1595_v21 = vmax.f32 %v3433_v25, %v3437_v33 }
 0x181   : > { %v2520_v28 = vpack.c.bf16 %v729_v53, %v723_v44 }
 0x182   : > { %2487 = vmatmul.mubr.msk.f32.gmra.mrb[84].mxu0 %vm301_vm1, %v293_v16 }
 0x183   : > { %2521 = vmatprep.subr.bf16.mxu1 %v2520_v28 }
 0x184   : > { %2523 = vmatpush1.bf16.xpose.msra.mxu1 %v2522_v12 }
 0x185   : > { %2525 = vmatprep.subr.bf16.mxu1 %v4220_v43  ;;  %v1598_v43 = vmax.f32 %v3464_v38, %v3470_v4 }
 0x1ca   : > { %v884_v14 = vpop.xlane.xlu0 %883 }
 0x1cb   : > { %v894_v1 = vsub.f32 %v3296_v22, %v884_v14  ;;  %v895_v44 = vsub.f32 %v3301_v30, %v884_v14 }
 0x1cc   : > { %v890_v26 = vpop.xlane.xlu1 %889 }
 0x1cd   : > { %v902_v12 = vmul.f32 1.442695, %v894_v1  ;;  %v904_v53 = vmul.f32 1.442695, %v895_v44  ;;  %v898_v24 = vsub.f32 %v3326_v18, %v890_v26  ;;  %v899_v28 = vsub.f32 %v3332_v56, %v890_v26 }
 0x1ce   : > { %v887_v8 = vpop.xlane.xlu0 %886 }
 0x1cf   : > { %2738 = vpow2.f32 %v902_v12  ;;  %v896_v51 = vsub.f32 %v3318_v57, %v887_v8  ;;  %v897_v10 = vsub.f32 %v3323_v7, %v887_v8  ;;  %v910_v16 = vmul.f32 1.442695, %v898_v24 }
 0x1d0   : > { %2740 = vpow2.f32 %v904_v53  ;;  %v912_v22 = vmul.f32 1.442695, %v899_v28  ;;  %v893_v30 = vpop.xlane.xlu1 %892  ;;  %v1601_v7 = vmax.f32 %v3488_v27, %v3492_v36 }
 0x1d1   : > { %v906_v14 = vmul.f32 1.442695, %v896_v51  ;;  %v908_v1 = vmul.f32 1.442695, %v897_v10  ;;  %2742 = vpow2.f32 %v910_v16  ;;  %v900_v18 = vsub.f32 %v3338_v40, %v893_v30 }
 0x1d2   : > { %2744 = vpow2.f32 %v912_v22  ;;  %v901_v56 = vsub.f32 %v3342_v48, %v893_v30 }
 0x1d3   : > { %2746 = vpow2.f32 %v906_v14  ;;  %v914_v44 = vmul.f32 1.442695, %v900_v18 }
 0x1d4   : > { %2748 = vpow2.f32 %v908_v1  ;;  %v916_v57 = vmul.f32 1.442695, %v901_v56  ;;  %v4221_v56 = vmax.f32 %v3354_v9, %v3361_v46 }
 0x1d5   : > { %2750 = vpow2.f32 %v914_v44 }
 0x1d6   : > { %2752 = vpow2.f32 %v916_v57  ;;  %v4222_v57 = vmax.f32 %v3386_v62, %v3393_v52 }
 0x1d9   : > { %v2739_v26 = vpop.eup %2738 }
 0x1da   : > { %v2741_v12 = vpop.eup %2740 }
 0x1db   : > { %v3651_v53 = vpop.eup %2742  ;;  %v918_v40 = vadd.f32 %v2741_v12, %v2739_v26 }
 0x1dc   : > { %v3653_v24 = vpop.eup %2744 }
 0x1dd   : > { %v2747_v28 = vpop.eup %2746  ;;  %919 = vadd.xlane.f32.xlu0 %v918_v40  ;;  %v924_v51 = vadd.f32 %v3653_v24, %v3651_v53  ;;  %v4223_v40 = vmax.f32 %v3405_v61, %v3408_v45 }
 0x1de   : > { %v2749_v10 = vpop.eup %2748 }
 0x1df   : > { %v3659_v16 = vpop.eup %2750  ;;  %v921_v22 = vadd.f32 %v2749_v10, %v2747_v28 }
 0x1e0   : > { %v3661_v30 = vpop.eup %2752 }
 0x1e1   : > { %922 = vadd.xlane.f32.xlu1 %v921_v22  ;;  %925 = vadd.xlane.f32.xlu0 %v924_v51  ;;  %v927_v1 = vadd.f32 %v3661_v30, %v3659_v16  ;;  %v4224_v51 = vmax.f32 %v3416_v17, %v3420_v20  ;;  %v297_v22 = vld [vmem:[%s4161_s1 + $0x170] sm:$0xff] }
 0x1e2   : > { %2491 = vmatmul.mubr.msk.f32.gmra.mrb[6].mxu1 %vm301_vm1, %v297_v22 }
 0x1e3   : > { %797 = vmatprep.mubr.f32.mxu1 %v4211_v0 }
 0x1e5   : > { %928 = vadd.xlane.f32.xlu1 %v927_v1  ;;  %1240 = vmax.xlane.f32.xlu0 %v4221_v56  ;;  %v298_v1 = vld [vmem:[%s4161_s1 + $0x178] sm:$0xff] }
 0x1e6   : > { %2492 = vmatmul.mubr.msk.f32.gmra.mrb[8].mxu1 %vm301_vm1, %v298_v1 }
 0x1e9   : > { %1243 = vmax.xlane.f32.xlu1 %v4222_v57  ;;  %1246 = vmax.xlane.f32.xlu0 %v4223_v40 }
 0x1ed   : > { %1249 = vmax.xlane.f32.xlu1 %v4224_v51 }
 0x26a   : > { %v920_v56 = vpop.xlane.xlu0 %919 }
 0x26b   : > { %2754 = vrcp.f32 %v920_v56 }
 0x26e   : > { %v923_v57 = vpop.xlane.xlu1 %922  ;;  %v926_v40 = vpop.xlane.xlu0 %925 }
 0x26f   : > { %2756 = vrcp.f32 %v923_v57 }
 0x270   : > { %2758 = vrcp.f32 %v926_v40 }
 0x272   : > { %v929_v51 = vpop.xlane.xlu1 %928  ;;  %v1241_v31 = vpop.xlane.xlu0 %1240 }
 0x273   : > { %2760 = vrcp.f32 %v929_v51  ;;  %v1251_v32 = vsub.f32 %v3354_v9, %v1241_v31  ;;  %v1252_v22 = vsub.f32 %v3361_v46, %v1241_v31 }
 0x275   : > { %v2755_v60 = vpop.eup %2754  ;;  %v1259_v14 = vmul.f32 1.442695, %v1251_v32  ;;  %v1261_v44 = vmul.f32 1.442695, %v1252_v22 }
 0x276   : > { %v931_v18 = vmul.f32 %v2755_v60, %v2739_v26  ;;  %v932_v48 = vmul.f32 %v2755_v60, %v2741_v12  ;;  %v1244_v8 = vpop.xlane.xlu1 %1243  ;;  %v1247_v1 = vpop.xlane.xlu0 %1246  ;;  %v4225_v60 = vpack.c.bf16 %v3365_v19, %v3350_v59 }
 0x277   : > { %2762 = vpow2.f32 %v1259_v14  ;;  %v1253_v56 = vsub.f32 %v3386_v62, %v1244_v8  ;;  %v1254_v57 = vsub.f32 %v3393_v52, %v1244_v8  ;;  %v1255_v40 = vsub.f32 %v3405_v61, %v1247_v1 }
 0x278   : > { %2764 = vpow2.f32 %v1261_v44  ;;  %1006 = vmatprep.mubr.f32.mxu1 %v932_v48  ;;  %v1256_v9 = vsub.f32 %v3408_v45, %v1247_v1  ;;  %v4226_v61 = vpack.c.bf16 %v3410_v23, %v3378_v37  ;;  %v4228_v44 = vld [vmem:[#allocation5_spill] sm:$0xff] }
 0x279   : > { %v2757_v51 = vpop.eup %2756  ;;  %1007 = vmatmul.mubr.f32.vlgmr.msra.gmra.mrb[10].mxu1 %v931_v18  ;;  %v1263_v46 = vmul.f32 1.442695, %v1253_v56  ;;  %v1265_v32 = vmul.f32 1.442695, %v1254_v57  ;;  %v1267_v31 = vmul.f32 1.442695, %v1255_v40 }
 0x27a   : > { %v2759_v26 = vpop.eup %2758  ;;  %2527 = vmatpush1.bf16.msra.mxu1 %v4225_v60  ;;  %v1269_v12 = vmul.f32 1.442695, %v1256_v9  ;;  %v935_v62 = vmul.f32 %v2757_v51, %v2749_v10  ;;  %v934_v14 = vmul.f32 %v2757_v51, %v2747_v28  ;;  %v1250_v52 = vpop.xlane.xlu1 %1249  ;;  %v4227_v10 = vld [vmem:[#allocation6_spill] sm:$0xff] }
 0x27b   : > { %2766 = vpow2.f32 %v1263_v46  ;;  %2529 = vmatprep.subr.bf16.mxu1 %v4226_v61  ;;  %v1257_v45 = vsub.f32 %v3416_v17, %v1250_v52  ;;  %v1258_v8 = vsub.f32 %v3420_v20, %v1250_v52  ;;  %v938_v48 = vmul.f32 %v2759_v26, %v3653_v24 }
 0x27c   : > { %2768 = vpow2.f32 %v1265_v32  ;;  %1011 = vmatprep.mubr.f32.mxu1 %v935_v62  ;;  %v937_v28 = vmul.f32 %v2759_v26, %v3651_v53  ;;  %v4229_v37 = vpack.c.bf16 %v4227_v10, %v4228_v44  ;;  %v4230_v46 = vmax.f32 %v3496_v34, %v3498_v6  ;;  %v3750_v32 = vpop.f32.mrb[72].mxu0 }
 0x27d   : > { %v2761_v18 = vpop.eup %2760  ;;  %2770 = vpow2.f32 %v1267_v31  ;;  %1012 = vmatmul.mubr.f32.gmra.mrb[12].mxu1 %v934_v14  ;;  %v1271_v59 = vmul.f32 1.442695, %v1257_v45  ;;  %v1273_v19 = vmul.f32 1.442695, %v1258_v8  ;;  %v735_v31 = vpop.f32.mrb[73].mxu0 }
 0x27e   : > { %2772 = vpow2.f32 %v1269_v12  ;;  %2531 = vmatpush1.bf16.msra.mxu1 %v4229_v37  ;;  %1016 = vmatprep.mubr.f32.mxu1 %v938_v48  ;;  %v941_v23 = vmul.f32 %v2761_v18, %v3661_v30  ;;  %v940_v20 = vmul.f32 %v2761_v18, %v3659_v16  ;;  %v3752_v26 = vpop.f32.mrb[74].mxu0  ;;  %v3756_v12 = vpop.f32.mrb[0].mxu1 }
 0x27f   : > { %2774 = vpow2.f32 %v1271_v59  ;;  %v741_v60 = vpop.f32.mrb[75].mxu0  ;;  %v3768_v45 = vpop.f32.mrb[1].mxu1 }
 0x280   : > { %2776 = vpow2.f32 %v1273_v19  ;;  %v3758_v62 = vpop.f32.mrb[76].mxu0  ;;  %v3774_v18 = vpop.f32.mrb[2].mxu1 }
 0x281   : > { %v3712_v17 = vpop.eup %2762  ;;  %1017 = vmatmul.mubr.f32.gmra.mrb[14].mxu1 %v937_v28  ;;  %v3760_v14 = vpop.f32.mrb[77].mxu0 }
 0x282   : > { %v3715_v24 = vpop.eup %2764  ;;  %1021 = vmatprep.mubr.f32.mxu1 %v941_v23  ;;  %v3778_v19 = vpop.f32.mrb[3].mxu1 }
 0x283   : > { %v1275_v53 = vadd.f32 %v3715_v24, %v3712_v17  ;;  %v3782_v10 = vpop.f32.mrb[4].mxu1 }
 0x285   : > { %v3719_v22 = vpop.eup %2766  ;;  %1022 = vmatmul.mubr.f32.gmra.mrb[16].mxu1 %v940_v20  ;;  %1276 = vadd.xlane.f32.xlu0 %v1275_v53  ;;  %v3790_v20 = vpop.f32.mrb[5].mxu1 }
 0x286   : > { %v3721_v1 = vpop.eup %2768  ;;  %1136 = vmatprep.mubr.f32.mxu1 %v4211_v0 }
 0x287   : > { %v3724_v30 = vpop.eup %2770  ;;  %v1278_v56 = vadd.f32 %v3721_v1, %v3719_v22 }
 0x288   : > { %v3728_v16 = vpop.eup %2772 }
 0x289   : > { %v3730_v57 = vpop.eup %2774  ;;  %v1281_v40 = vadd.f32 %v3728_v16, %v3724_v30  ;;  %1279 = vadd.xlane.f32.xlu1 %v1278_v56 }
 0x28a   : > { %v3734_v9 = vpop.eup %2776 }
 0x28b   : > { %1282 = vadd.xlane.f32.xlu0 %v1281_v40  ;;  %v1284_v51 = vadd.f32 %v3734_v9, %v3730_v57 }
 0x28d   : > { %1285 = vadd.xlane.f32.xlu1 %v1284_v51 }
 0x291   : > { %1596 = vmax.xlane.f32.xlu1 %v1595_v21 }
 0x295   : > { %1599 = vmax.xlane.f32.xlu1 %v1598_v43  ;;  %v2532_v43 = vpack.c.bf16 %v741_v60, %v735_v31 }
 0x297   : > { %2533 = vmatprep.subr.bf16.mxu1 %v2532_v43 }
 0x299   : > { %1602 = vmax.xlane.f32.xlu1 %v1601_v7  ;;  %v3762_v7 = vpop.f32.mrb[78].mxu0 }
 0x29a   : > { %v3766_v61 = vpop.f32.mrb[79].mxu0 }
 0x29b   : > { %v3772_v48 = vpop.f32.mrb[80].mxu0 }
 0x29c   : > { %v3776_v59 = vpop.f32.mrb[81].mxu0 }
 0x29d   : > { %1605 = vmax.xlane.f32.xlu1 %v4230_v46  ;;  %v3780_v28 = vpop.f32.mrb[82].mxu0 }
 0x29e   : > { %v3786_v37 = vpop.f32.mrb[83].mxu0 }
 0x29f   : > { %v3794_v56 = vpop.f32.mrb[84].mxu0 }
 0x2a0   : > { %v3800_v46 = vpop.f32.mrb[85].mxu0 }
 0x2b5   : > { %v3804_v60 = vpop.f32.mrb[6].mxu1 }
 0x2b6   : > { %v3806_v43 = vpop.f32.mrb[7].mxu1 }
 0x2b9   : > { %v3808_v23 = vpop.f32.mrb[8].mxu1 }
 0x2ba   : > { %v3812_v53 = vpop.f32.mrb[9].mxu1 }
 0x316   : > { %v3816_v51 = vpop.xlane.xlu1 %1279 }
 0x31a   : > { %v3818_v52 = vpop.xlane.xlu1 %1285 }
 0x31e   : > { %v1597_v8 = vpop.xlane.xlu1 %1596 }
 0x31f   : > { %v1607_v31 = vsub.f32 %v3433_v25, %v1597_v8  ;;  %v1608_v21 = vsub.f32 %v3437_v33, %v1597_v8 }
 0x321   : > { %v1615_v41 = vmul.f32 1.442695, %v1607_v31  ;;  %v1617_v29 = vmul.f32 1.442695, %v1608_v21 }
 0x322   : > { %v1600_v42 = vpop.xlane.xlu1 %1599 }
 0x323   : > { %2778 = vpow2.f32 %v1615_v41  ;;  %v1609_v44 = vsub.f32 %v3464_v38, %v1600_v42  ;;  %v1610_v54 = vsub.f32 %v3470_v4, %v1600_v42 }
 0x324   : > { %2780 = vpow2.f32 %v1617_v29 }
 0x325   : > { %v1619_v63 = vmul.f32 1.442695, %v1609_v44  ;;  %v1621_v40 = vmul.f32 1.442695, %v1610_v54 }
 0x326   : > { %v1603_v15 = vpop.xlane.xlu1 %1602 }
 0x327   : > { %2782 = vpow2.f32 %v1619_v63  ;;  %v1611_v35 = vsub.f32 %v3488_v27, %v1603_v15  ;;  %v1612_v50 = vsub.f32 %v3492_v36, %v1603_v15 }
 0x328   : > { %2784 = vpow2.f32 %v1621_v40 }
 0x329   : > { %v1623_v25 = vmul.f32 1.442695, %v1611_v35  ;;  %v1625_v33 = vmul.f32 1.442695, %v1612_v50 }
 0x32a   : > { %v1606_v8 = vpop.xlane.xlu1 %1605 }
 0x32b   : > { %2786 = vpow2.f32 %v1623_v25  ;;  %v1613_v41 = vsub.f32 %v3496_v34, %v1606_v8  ;;  %v1614_v38 = vsub.f32 %v3498_v6, %v1606_v8 }
 0x32c   : > { %2788 = vpow2.f32 %v1625_v33 }
 0x32d   : > { %v3828_v4 = vpop.eup %2778  ;;  %v1627_v29 = vmul.f32 1.442695, %v1613_v41  ;;  %v1629_v42 = vmul.f32 1.442695, %v1614_v38 }
 0x32e   : > { %v3830_v54 = vpop.eup %2780 }
 0x32f   : > { %2790 = vpow2.f32 %v1627_v29  ;;  %v1631_v27 = vadd.f32 %v3830_v54, %v3828_v4 }
 0x330   : > { %2792 = vpow2.f32 %v1629_v42  ;;  %v4231_v42 = vmax.f32 %v3504_v2, %v3506_v47 }
 0x331   : > { %v3834_v36 = vpop.eup %2782  ;;  %1632 = vadd.xlane.f32.xlu1 %v1631_v27  ;;  %v4232_v27 = vmax.f32 %v3546_v49, %v3548_v55 }
 0x332   : > { %v3836_v15 = vpop.eup %2784 }
 0x333   : > { %v1634_v34 = vadd.f32 %v3836_v15, %v3834_v36 }
 0x335   : > { %v3840_v6 = vpop.eup %2786  ;;  %1635 = vadd.xlane.f32.xlu1 %v1634_v34  ;;  %v4233_v34 = vmax.f32 %v3555_v3, %v3558_v39 }
 0x336   : > { %v3842_v63 = vpop.eup %2788 }
 0x337   : > { %v1637_v35 = vadd.f32 %v3842_v63, %v3840_v6 }
 0x339   : > { %v3846_v50 = vpop.eup %2790  ;;  %1638 = vadd.xlane.f32.xlu1 %v1637_v35  ;;  %v1277_v35 = vpop.xlane.xlu0 %1276 }
 0x33a   : > { %v3848_v21 = vpop.eup %2792  ;;  %2794 = vrcp.f32 %v1277_v35  ;;  %v4243_v35 = vld [vmem:[#allocation12_spill] sm:$0xff] }
 0x33b   : > { %v1640_v44 = vadd.f32 %v3848_v21, %v3846_v50  ;;  %2796 = vrcp.f32 %v3816_v51 }
 0x33d   : > { %1641 = vadd.xlane.f32.xlu1 %v1640_v44  ;;  %v1283_v44 = vpop.xlane.xlu0 %1282 }
 0x33e   : > { %2798 = vrcp.f32 %v1283_v44  ;;  %v4244_v44 = vld [vmem:[#allocation11_spill] sm:$0xff] }
 0x33f   : > { %2800 = vrcp.f32 %v3818_v52 }
 0x34c   : > { %v1008_v40 = vpop.f32.mrb[10].mxu1 }
 0x34d   : > { %1027 = vxpose.xlu0.b32.start [1/4] (short) (narrow) %v1008_v40, 32  ;;  %v1010_v31 = vpop.f32.mrb[11].mxu1 }
 0x34e   : > { %v4234_v31 = vpack.c.bf16 %v3752_v26, %v3750_v32  ;;  %v4236_v32 = vpack.c.bf16 %v3762_v7, %v3758_v62  ;;  %v4237_v26 = vld [vmem:[#allocation10_spill] sm:$0xff] }
 0x350   : > { %v1013_v25 = vpop.f32.mrb[12].mxu1 }
 0x351   : > { %1028 = vxpose.xlu0.b32.cont [2/4] (short) (narrow) %v1013_v25, 32  ;;  %v1015_v33 = vpop.f32.mrb[13].mxu1  ;;  %v4235_v25 = vpack.c.bf16 %v3766_v61, %v3760_v14  ;;  %v4238_v14 = vld [vmem:[#allocation9_spill] sm:$0xff] }
 0x352   : > { %v4239_v61 = vpack.c.bf16 %v4237_v26, %v4238_v14 }
 0x354   : > { %v1018_v8 = vpop.f32.mrb[14].mxu1 }
 0x355   : > { %1029 = vxpose.xlu0.b32.cont [3/4] (short) (narrow) %v1018_v8, 32  ;;  %v1020_v41 = vpop.f32.mrb[15].mxu1 }
 0x356   : > { %v2795_v41 = vpop.eup %2794 }
 0x358   : > { %v1023_v38 = vpop.f32.mrb[16].mxu1 }
 0x359   : > { %1030 = vxpose.xlu0.b32.end [4/4] (short) (narrow) %v1023_v38, 32  ;;  %v1025_v29 = vpop.f32.mrb[17].mxu1  ;;  %v1289_v38 = vmul.f32 %v2795_v41, %v3715_v24 }
 0x35a   : > { %v2797_v29 = vpop.eup %2796 }
 0x35b   : > { %v1292_v62 = vmul.f32 %v2797_v29, %v3721_v1  ;;  %v2799_v7 = vpop.eup %2798  ;;  %v1291_v24 = vmul.f32 %v2797_v29, %v3719_v22 }
 0x386   : > { %1952 = vmax.xlane.f32.xlu0 %v4231_v42  ;;  %v1288_v42 = vmul.f32 %v2795_v41, %v3712_v17  ;;  %v4246_v17 = vld [vmem:[#allocation14_spill] sm:$0xff]  ;;  %v4249_v41 = vpack.c.bf16 %v3786_v37, %v3776_v59 }
 0x38a   : > { %1958 = vmax.xlane.f32.xlu0 %v4232_v27  ;;  %v4240_v27 = vld [vmem:[#allocation8_spill] sm:$0xff] }
 0x38e   : > { %1961 = vmax.xlane.f32.xlu0 %v4233_v34  ;;  %v4241_v34 = vld [vmem:[#allocation7_spill] sm:$0xff] }
 0x38f   : > { %v4242_v52 = vpack.c.bf16 %v4240_v27, %v4241_v34 }
 0x3cd   : > { %v1043_v40 = vpop.trf.xlu0 }
 0x3ce   : > { %2493 = vmatmul.mubr.msk.f32.vlgmr.msra.gmra.mrb[18].mxu1 %vm1059_vm2, %v1043_v40  ;;  %v4245_v40 = vpack.c.bf16 %v4243_v35, %v4244_v44 }
 0x3cf   : > { %2535 = vmatpush1.bf16.xpose.msra.mxu1 %v4234_v31  ;;  %1142 = vmatprep.mubr.f32.mxu1 %v4211_v0  ;;  %v1295_v31 = vmul.f32 %v2799_v7, %v3728_v16 }
 0x3d0   : > { %2537 = vmatprep.subr.bf16.mxu1 %v4235_v25  ;;  %v2801_v25 = vpop.eup %2800 }
 0x3d1   : > { %v1044_v33 = vpop.trf.xlu0  ;;  %v1297_v22 = vmul.f32 %v2801_v25, %v3730_v57 }
 0x3d2   : > { %2494 = vmatmul.mubr.msk.f32.gmra.mrb[20].mxu1 %vm1059_vm2, %v1044_v33  ;;  %v4247_v33 = vld [vmem:[#allocation13_spill] sm:$0xff] }
 0x3d3   : > { %1148 = vmatprep.mubr.f32.mxu1 %v4211_v0  ;;  %v4248_v1 = vpack.c.bf16 %v4246_v17, %v4247_v33 }
 0x3d5   : > { %v1045_v8 = vpop.trf.xlu0 }
 0x3d6   : > { %2495 = vmatmul.mubr.msk.f32.gmra.mrb[22].mxu1 %vm1059_vm2, %v1045_v8  ;;  %v1294_v8 = vmul.f32 %v2799_v7, %v3724_v30 }
 0x3d7   : > { %2539 = vmatpush1.bf16.xpose.msra.mxu1 %v4236_v32  ;;  %1154 = vmatprep.mubr.f32.mxu1 %v4211_v0  ;;  %v1298_v32 = vmul.f32 %v2801_v25, %v3734_v9 }
 0x3d8   : > { %2541 = vmatprep.subr.bf16.mxu1 %v4239_v61 }
 0x3d9   : > { %v1046_v51 = vpop.trf.xlu0 }
 0x3da   : > { %2496 = vmatmul.mubr.msk.f32.gmra.mrb[24].mxu1 %vm1059_vm2, %v1046_v51 }
 0x3db   : > { %1363 = vmatprep.mubr.f32.mxu1 %v1289_v38 }
 0x3de   : > { %1364 = vmatmul.mubr.f32.vlgmr.msra.gmra.mrb[26].mxu1 %v1288_v42 }
 0x3df   : > { %2543 = vmatpush1.bf16.msra.mxu1 %v4242_v52  ;;  %1368 = vmatprep.mubr.f32.mxu1 %v1292_v62 }
 0x3e0   : > { %2545 = vmatprep.subr.bf16.mxu1 %v4245_v40 }
 0x3e2   : > { %1369 = vmatmul.mubr.f32.gmra.mrb[28].mxu1 %v1291_v24 }
 0x3e3   : > { %2547 = vmatpush1.bf16.msra.mxu1 %v4248_v1  ;;  %1373 = vmatprep.mubr.f32.mxu1 %v1295_v31  ;;  %v4250_v1 = vmax.f32 %v3522_v58, %v3527_v5 }
 0x3e4   : > { %2549 = vmatprep.subr.bf16.mxu1 %v4249_v41 }
 0x3e6   : > { %1374 = vmatmul.mubr.f32.gmra.mrb[30].mxu1 %v1294_v8  ;;  %v1633_v8 = vpop.xlane.xlu1 %1632 }
 0x3e7   : > { %1378 = vmatprep.mubr.f32.mxu1 %v1298_v32 }
 0x3ea   : > { %1379 = vmatmul.mubr.f32.gmra.mrb[32].mxu1 %v1297_v22  ;;  %v1636_v41 = vpop.xlane.xlu1 %1635 }
 0x3eb   : > { %1492 = vmatprep.mubr.f32.mxu1 %v4211_v0 }
 0x3ee   : > { %v1639_v32 = vpop.xlane.xlu1 %1638 }
 0x3f2   : > { %v1642_v22 = vpop.xlane.xlu1 %1641 }
 0x413   : > { %v1953_v16 = vpop.xlane.xlu0 %1952 }
 0x414   : > { %v1963_v26 = vsub.f32 %v3504_v2, %v1953_v16  ;;  %v1964_v14 = vsub.f32 %v3506_v47, %v1953_v16 }
 0x416   : > { %v1971_v61 = vmul.f32 1.442695, %v1963_v26  ;;  %v1973_v30 = vmul.f32 1.442695, %v1964_v14  ;;  %v4251_v26 = vpack.c.bf16 %v3780_v28, %v3772_v48  ;;  %v4252_v14 = vpack.c.bf16 %v3768_v45, %v3800_v46 }
 0x417   : > { %v4253_v48 = vpack.c.bf16 %v3756_v12, %v3794_v56  ;;  %v4254_v45 = vpack.c.bf16 %v3531_v11, %v3529_v13  ;;  %v4255_v56 = vld [vmem:[#allocation16_spill] sm:$0xff]  ;;  %v4259_v13 = vld [vmem:[#allocation19_spill] sm:$0xff] }
 0x418   : > { %2802 = vpow2.f32 %v1971_v61  ;;  %v4258_v11 = vld [vmem:[#allocation20_spill] sm:$0xff] }
 0x419   : > { %2804 = vpow2.f32 %v1973_v30 }
 0x41a   : > { %2806 = vrcp.f32 %v1633_v8  ;;  %v4264_v8 = vpack.c.bf16 %v3790_v20, %v3778_v19 }
 0x41b   : > { %2808 = vrcp.f32 %v1636_v41 }
 0x41c   : > { %2810 = vrcp.f32 %v1639_v32 }
 0x41d   : > { %2812 = vrcp.f32 %v1642_v22 }
 0x422   : > { %v3905_v59 = vpop.eup %2802 }
 0x423   : > { %v3907_v37 = vpop.eup %2804 }
 0x424   : > { %v1987_v9 = vadd.f32 %v3907_v37, %v3905_v59 }
 0x426   : > { %1988 = vadd.xlane.f32.xlu0 %v1987_v9  ;;  %v2807_v9 = vpop.eup %2806 }
 0x427   : > { %v1645_v46 = vmul.f32 %v2807_v9, %v3830_v54 }
 0x4a1   : > { %v3911_v57 = vpop.f32.mrb[18].mxu1 }
 0x4a2   : > { %v3913_v51 = vpop.f32.mrb[19].mxu1 }
 0x4a5   : > { %v3915_v38 = vpop.f32.mrb[20].mxu1 }
 0x4a6   : > { %v2582_v2 = vpack.c.bf16 %v3915_v38, %v3911_v57  ;;  %v3919_v47 = vpop.f32.mrb[21].mxu1 }
 0x4a7   : > { %v2580_v29 = vpack.c.bf16 %v3919_v47, %v3913_v51 }
 0x4a9   : > { %v3923_v42 = vpop.f32.mrb[22].mxu1 }
 0x4aa   : > { %v3925_v62 = vpop.f32.mrb[23].mxu1 }
 0x4ad   : > { %v3927_v7 = vpop.f32.mrb[24].mxu1 }
 0x4ae   : > { %v2586_v27 = vpack.c.bf16 %v3927_v7, %v3923_v42  ;;  %v3931_v34 = vpop.f32.mrb[25].mxu1  ;;  %v2901_v42 = vmov 0  }
 0x4af   : > { %v2584_v52 = vpack.c.bf16 %v3931_v34, %v3925_v62 }
 0x4b1   : > { %v1365_v35 = vpop.f32.mrb[26].mxu1 }
 0x4b2   : > { %1384 = vxpose.xlu1.b32.start [1/4] (short) (narrow) %v1365_v35, 32  ;;  %v1367_v44 = vpop.f32.mrb[27].mxu1  ;;  %v2809_v35 = vpop.eup %2808 }
 0x4b3   : > { %v1644_v44 = vmul.f32 %v2807_v9, %v3828_v4  ;;  %v2811_v12 = vpop.eup %2810  ;;  %v1647_v54 = vmul.f32 %v2809_v35, %v3834_v36  ;;  %v4261_v4 = vld [vmem:[#allocation18_spill] sm:$0xff] }
 0x4b4   : > { %v1650_v41 = vmul.f32 %v2811_v12, %v3840_v6 }
 0x4b5   : > { %v1370_v40 = vpop.f32.mrb[28].mxu1 }
 0x4b6   : > { %1385 = vxpose.xlu1.b32.cont [2/4] (short) (narrow) %v1370_v40, 32  ;;  %v1372_v24 = vpop.f32.mrb[29].mxu1  ;;  %v1648_v40 = vmul.f32 %v2809_v35, %v3836_v15 }
 0x4b7   : > { %v4256_v24 = vld [vmem:[#allocation15_spill] sm:$0xff] }
 0x4b9   : > { %v1375_v31 = vpop.f32.mrb[30].mxu1 }
 0x4ba   : > { %1386 = vxpose.xlu1.b32.cont [3/4] (short) (narrow) %v1375_v31, 32  ;;  %v1377_v25 = vpop.f32.mrb[31].mxu1  ;;  %v4257_v31 = vpack.c.bf16 %v4255_v56, %v4256_v24 }
 0x4bb   : > { %v4260_v25 = vpack.c.bf16 %v4258_v11, %v4259_v13 }
 0x4bd   : > { %v1380_v17 = vpop.f32.mrb[32].mxu1 }
 0x4be   : > { %1387 = vxpose.xlu1.b32.end [4/4] (short) (narrow) %v1380_v17, 32  ;;  %v1382_v33 = vpop.f32.mrb[33].mxu1  ;;  %v1651_v17 = vmul.f32 %v2811_v12, %v3842_v63  ;;  %v1959_v63 = vpop.xlane.xlu0 %1958 }
 0x4bf   : > { %v2813_v33 = vpop.eup %2812  ;;  %v1967_v22 = vsub.f32 %v3546_v49, %v1959_v63 }
 0x4c0   : > { %v1654_v32 = vmul.f32 %v2813_v33, %v3848_v21  ;;  %v1653_v36 = vmul.f32 %v2813_v33, %v3846_v50 }
 0x4c1   : > { %v1979_v6 = vmul.f32 1.442695, %v1967_v22 }
 0x4e5   : > { %1955 = vmax.xlane.f32.xlu1 %v4250_v1  ;;  %v4262_v1 = vld [vmem:[#allocation17_spill] sm:$0xff] }
 0x4e6   : > { %v4263_v15 = vpack.c.bf16 %v4261_v4, %v4262_v1 }
 0x532   : > { %v1400_v16 = vpop.trf.xlu1 }
 0x533   : > { %2497 = vmatmul.mubr.msk.f32.vlgmr.msra.gmra.mrb[34].mxu1 %vm1059_vm2, %v1400_v16  ;;  %v1968_v16 = vsub.f32 %v3548_v55, %v1959_v63 }
 0x534   : > { %2551 = vmatpush1.bf16.xpose.msra.mxu1 %v4251_v26  ;;  %1498 = vmatprep.mubr.f32.mxu1 %v4211_v0  ;;  %v1962_v26 = vpop.xlane.xlu0 %1961 }
 0x535   : > { %2553 = vmatprep.subr.bf16.mxu1 %v4252_v14  ;;  %v1969_v21 = vsub.f32 %v3555_v3, %v1962_v26  ;;  %v1981_v50 = vmul.f32 1.442695, %v1968_v16  ;;  %v1970_v9 = vsub.f32 %v3558_v39, %v1962_v26 }
 0x536   : > { %v1401_v61 = vpop.trf.xlu1 }
 0x537   : > { %2498 = vmatmul.mubr.msk.f32.gmra.mrb[36].mxu1 %vm1059_vm2, %v1401_v61  ;;  %v1983_v49 = vmul.f32 1.442695, %v1969_v21  ;;  %v1985_v55 = vmul.f32 1.442695, %v1970_v9 }
 0x538   : > { %1504 = vmatprep.mubr.f32.mxu1 %v4211_v0  ;;  %v1989_v22 = vpop.xlane.xlu0 %1988 }
 0x53a   : > { %v1402_v30 = vpop.trf.xlu1 }
 0x53b   : > { %2499 = vmatmul.mubr.msk.f32.gmra.mrb[38].mxu1 %vm1059_vm2, %v1402_v30 }
 0x53c   : > { %2555 = vmatpush1.bf16.xpose.msra.mxu1 %v4253_v48  ;;  %1510 = vmatprep.mubr.f32.mxu1 %v4211_v0 }
 0x53d   : > { %2557 = vmatprep.subr.bf16.mxu1 %v4254_v45 }
 0x53e   : > { %v1403_v28 = vpop.trf.xlu1 }
 0x53f   : > { %2500 = vmatmul.mubr.msk.f32.gmra.mrb[40].mxu1 %vm1059_vm2, %v1403_v28 }
 0x540   : > { %1719 = vmatprep.mubr.f32.mxu1 %v1645_v46 }
 0x543   : > { %1720 = vmatmul.mubr.f32.vlgmr.msra.gmra.mrb[42].mxu1 %v1644_v44 }
 0x544   : > { %2559 = vmatpush1.bf16.msra.mxu1 %v4257_v31  ;;  %1724 = vmatprep.mubr.f32.mxu1 %v1648_v40 }
 0x545   : > { %2561 = vmatprep.subr.bf16.mxu1 %v4260_v25 }
 0x547   : > { %1725 = vmatmul.mubr.f32.gmra.mrb[44].mxu1 %v1647_v54 }
 0x548   : > { %2563 = vmatpush1.bf16.msra.mxu1 %v4263_v15  ;;  %1729 = vmatprep.mubr.f32.mxu1 %v1651_v17 }
 0x549   : > { %2565 = vmatprep.subr.bf16.mxu1 %v4264_v8 }
 0x54b   : > { %1730 = vmatmul.mubr.f32.gmra.mrb[46].mxu1 %v1650_v41 }
 0x54c   : > { %1734 = vmatprep.mubr.f32.mxu1 %v1654_v32 }
 0x54f   : > { %1735 = vmatmul.mubr.f32.gmra.mrb[48].mxu1 %v1653_v36 }
 0x550   : > { %1848 = vmatprep.mubr.f32.mxu1 %v4211_v0 }
 0x572   : > { %v1956_v14 = vpop.xlane.xlu1 %1955 }
 0x573   : > { %v1965_v19 = vsub.f32 %v3522_v58, %v1956_v14  ;;  %v1966_v20 = vsub.f32 %v3527_v5, %v1956_v14 }
 0x575   : > { %v1975_v61 = vmul.f32 1.442695, %v1965_v19  ;;  %v1977_v30 = vmul.f32 1.442695, %v1966_v20  ;;  %v4265_v20 = vpack.c.bf16 %v3782_v10, %v3774_v18  ;;  %v4267_v18 = vpack.c.bf16 %v3808_v23, %v3804_v60  ;;  %v4268_v10 = vld [vmem:[#allocation26_spill] sm:$0xff] }
 0x576   : > { %v4271_v60 = vld [vmem:[#allocation22_spill] sm:$0xff] }
 0x577   : > { %2814 = vpow2.f32 %v1975_v61 }
 0x578   : > { %2816 = vpow2.f32 %v1977_v30 }
 0x579   : > { %2818 = vpow2.f32 %v1979_v6  ;;  %v4266_v6 = vpack.c.bf16 %v3812_v53, %v3806_v43  ;;  %v4269_v53 = vld [vmem:[#allocation25_spill] sm:$0xff] }
 0x57a   : > { %2820 = vpow2.f32 %v1981_v50  ;;  %v4270_v43 = vpack.c.bf16 %v4268_v10, %v4269_v53 }
 0x57b   : > { %2822 = vpow2.f32 %v1983_v49 }
 0x57c   : > { %2824 = vpow2.f32 %v1985_v55 }
 0x57d   : > { %2826 = vrcp.f32 %v1989_v22 }
 0x581   : > { %v3984_v48 = vpop.eup %2814 }
 0x582   : > { %v3986_v58 = vpop.eup %2816 }
 0x583   : > { %v3988_v5 = vpop.eup %2818  ;;  %v1990_v3 = vadd.f32 %v3986_v58, %v3984_v48 }
 0x584   : > { %v3992_v45 = vpop.eup %2820 }
 0x585   : > { %1991 = vadd.xlane.f32.xlu0 %v1990_v3  ;;  %v3994_v39 = vpop.eup %2822  ;;  %v1993_v28 = vadd.f32 %v3992_v45, %v3988_v5 }
 0x586   : > { %v3998_v46 = vpop.eup %2824 }
 0x587   : > { %v1996_v35 = vadd.f32 %v3998_v46, %v3994_v39  ;;  %v2827_v30 = vpop.eup %2826 }
 0x588   : > { %v2001_v9 = vmul.f32 %v2827_v30, %v3907_v37  ;;  %v2000_v55 = vmul.f32 %v2827_v30, %v3905_v59  ;;  %v4277_v59 = vld [vmem:[#allocation24_spill] sm:$0xff] }
 0x589   : > { %1994 = vadd.xlane.f32.xlu0 %v1993_v28  ;;  %v4272_v28 = vld [vmem:[#allocation21_spill] sm:$0xff] }
 0x58d   : > { %1997 = vadd.xlane.f32.xlu0 %v1996_v35  ;;  %v4273_v35 = vpack.c.bf16 %v4271_v60, %v4272_v28 }
 0x606   : > { %v4002_v44 = vpop.f32.mrb[34].mxu1 }
 0x607   : > { %v4004_v40 = vpop.f32.mrb[35].mxu1 }
 0x60a   : > { %v4006_v12 = vpop.f32.mrb[36].mxu1 }
 0x60b   : > { %v2590_v56 = vpack.c.bf16 %v4006_v12, %v4002_v44  ;;  %v4010_v24 = vpop.f32.mrb[37].mxu1 }
 0x60c   : > { %v2588_v31 = vpack.c.bf16 %v4010_v24, %v4004_v40 }
 0x60e   : > { %v4014_v11 = vpop.f32.mrb[38].mxu1 }
 0x60f   : > { %v4016_v13 = vpop.f32.mrb[39].mxu1 }
 0x612   : > { %v4018_v25 = vpop.f32.mrb[40].mxu1  ;;  %v1992_v16 = vpop.xlane.xlu0 %1991 }
 0x613   : > { %v2594_v54 = vpack.c.bf16 %v4018_v25, %v4014_v11  ;;  %v4022_v17 = vpop.f32.mrb[41].mxu1  ;;  %2828 = vrcp.f32 %v1992_v16  ;;  %v2229_v11 = vld [vmem:[%s4162_s2] sm:$0xf] }
 0x614   : > { %v2592_v33 = vpack.c.bf16 %v4022_v17, %v4016_v13 }
 0x616   : > { %v1721_v4 = vpop.f32.mrb[42].mxu1  ;;  %v1995_v26 = vpop.xlane.xlu0 %1994 }
 0x617   : > { %1740 = vxpose.xlu0.b32.start [1/4] (short) (narrow) %v1721_v4, 32  ;;  %v1723_v1 = vpop.f32.mrb[43].mxu1  ;;  %2830 = vrcp.f32 %v1995_v26  ;;  %v4274_v4 = vld [vmem:[#allocation28_spill] sm:$0xff] }
 0x618   : > { %v4275_v1 = vld [vmem:[#allocation27_spill] sm:$0xff] }
 0x61a   : > { %v1726_v15 = vpop.f32.mrb[44].mxu1  ;;  %v1998_v14 = vpop.xlane.xlu0 %1997 }
 0x61b   : > { %1741 = vxpose.xlu0.b32.cont [2/4] (short) (narrow) %v1726_v15, 32  ;;  %v1728_v8 = vpop.f32.mrb[45].mxu1  ;;  %2832 = vrcp.f32 %v1998_v14  ;;  %v4276_v15 = vpack.c.bf16 %v4274_v4, %v4275_v1 }
 0x61d   : > { %v2829_v49 = vpop.eup %2828 }
 0x61e   : > { %v1731_v41 = vpop.f32.mrb[46].mxu1  ;;  %v2004_v3 = vmul.f32 %v2829_v49, %v3986_v58  ;;  %v2003_v37 = vmul.f32 %v2829_v49, %v3984_v48 }
 0x61f   : > { %1742 = vxpose.xlu0.b32.cont [3/4] (short) (narrow) %v1731_v41, 32  ;;  %v1733_v32 = vpop.f32.mrb[47].mxu1 }
 0x620   : > { %v4278_v32 = vld [vmem:[#allocation23_spill] sm:$0xff] }
 0x621   : > { %v2831_v23 = vpop.eup %2830  ;;  %v4279_v58 = vpack.c.bf16 %v4277_v59, %v4278_v32 }
 0x622   : > { %v1736_v36 = vpop.f32.mrb[48].mxu1  ;;  %v2007_v8 = vmul.f32 %v2831_v23, %v3992_v45 }
 0x623   : > { %1743 = vxpose.xlu0.b32.end [4/4] (short) (narrow) %v1736_v36, 32  ;;  %v1738_v63 = vpop.f32.mrb[49].mxu1  ;;  %v2006_v36 = vmul.f32 %v2831_v23, %v3988_v5  ;;  %v2349_v23 = vld [vmem:[%s4165_s5] sm:$0xf] }
 0x625   : > { %v2833_v41 = vpop.eup %2832 }
 0x626   : > { %v2010_v63 = vmul.f32 %v2833_v41, %v3998_v46  ;;  %v2009_v48 = vmul.f32 %v2833_v41, %v3994_v39 }
 0x64c   : > { %2655 = vset.pattern.permute.xlu0 %v2901_v42 }
 0x697   : > { %v1756_v19 = vpop.trf.xlu0 }
 0x698   : > { %2501 = vmatmul.mubr.msk.f32.vlgmr.msra.gmra.mrb[50].mxu1 %vm1059_vm2, %v1756_v19 }
 0x699   : > { %2567 = vmatpush1.bf16.xpose.msra.mxu1 %v4265_v20  ;;  %1854 = vmatprep.mubr.f32.mxu1 %v4211_v0 }
 0x69a   : > { %2569 = vmatprep.subr.bf16.mxu1 %v4266_v6 }
 0x69b   : > { %v1757_v21 = vpop.trf.xlu0 }
 0x69c   : > { %2502 = vmatmul.mubr.msk.f32.gmra.mrb[52].mxu1 %vm1059_vm2, %v1757_v21 }
 0x69d   : > { %1860 = vmatprep.mubr.f32.mxu1 %v4211_v0 }
 0x69f   : > { %v1758_v61 = vpop.trf.xlu0 }
 0x6a0   : > { %2503 = vmatmul.mubr.msk.f32.gmra.mrb[54].mxu1 %vm1059_vm2, %v1758_v61 }
 0x6a1   : > { %2571 = vmatpush1.bf16.xpose.msra.mxu1 %v4267_v18  ;;  %1866 = vmatprep.mubr.f32.mxu1 %v4211_v0 }
 0x6a2   : > { %2573 = vmatprep.subr.bf16.mxu1 %v4270_v43 }
 0x6a3   : > { %v1759_v50 = vpop.trf.xlu0 }
 0x6a4   : > { %2504 = vmatmul.mubr.msk.f32.gmra.mrb[56].mxu1 %vm1059_vm2, %v1759_v50 }
 0x6a5   : > { %2075 = vmatprep.mubr.f32.mxu1 %v2001_v9 }
 0x6a8   : > { %2076 = vmatmul.mubr.f32.vlgmr.msra.gmra.mrb[58].mxu1 %v2000_v55 }
 0x6a9   : > { %2575 = vmatpush1.bf16.msra.mxu1 %v4273_v35  ;;  %2080 = vmatprep.mubr.f32.mxu1 %v2004_v3  ;;  %v2341_v3 = vld [vmem:[%s4164_s4] sm:$0xf] }
 0x6aa   : > { %2577 = vmatprep.subr.bf16.mxu1 %v4276_v15 }
 0x6ac   : > { %2081 = vmatmul.mubr.f32.gmra.mrb[60].mxu1 %v2003_v37 }
 0x6ad   : > { %2579 = vmatpush1.bf16.msra.mxu1 %v4279_v58  ;;  %2085 = vmatprep.mubr.f32.mxu1 %v2007_v8 }
 0x6ae   : > { %2581 = vmatprep.subr.bf16.mxu1 %v2580_v29 }
 0x6b0   : > { %2086 = vmatmul.mubr.f32.gmra.mrb[62].mxu1 %v2006_v36 }
 0x6b1   : > { %2090 = vmatprep.mubr.f32.mxu1 %v2010_v63 }
 0x6b4   : > { %2091 = vmatmul.mubr.f32.gmra.mrb[64].mxu1 %v2009_v48 }
 0x6b5   : > { %2204 = vmatprep.mubr.f32.mxu1 %v4211_v0 }
 0x76b   : > { %v1850_v45 = vpop.f32.mrb[50].mxu1 }
 0x76c   : > { %v1852_v22 = vpop.f32.mrb[51].mxu1 }
 0x76f   : > { %v1856_v16 = vpop.f32.mrb[52].mxu1 }
 0x770   : > { %v2598_v26 = vpack.c.bf16 %v1856_v16, %v1850_v45  ;;  %v1858_v14 = vpop.f32.mrb[53].mxu1 }
 0x771   : > { %v2596_v19 = vpack.c.bf16 %v1858_v14, %v1852_v22 }
 0x773   : > { %v1862_v20 = vpop.f32.mrb[54].mxu1 }
 0x774   : > { %v1864_v51 = vpop.f32.mrb[55].mxu1 }
 0x777   : > { %v1868_v47 = vpop.f32.mrb[56].mxu1 }
 0x778   : > { %v2602_v29 = vpack.c.bf16 %v1868_v47, %v1862_v20  ;;  %v1870_v5 = vpop.f32.mrb[57].mxu1 }
 0x779   : > { %v2600_v6 = vpack.c.bf16 %v1870_v5, %v1864_v51 }
 0x77b   : > { %v2077_v46 = vpop.f32.mrb[58].mxu1 }
 0x77c   : > { %2096 = vxpose.xlu1.b32.start [1/4] (short) (narrow) %v2077_v46, 32  ;;  %v2079_v21 = vpop.f32.mrb[59].mxu1 }
 0x77f   : > { %v2082_v61 = vpop.f32.mrb[60].mxu1 }
 0x780   : > { %2097 = vxpose.xlu1.b32.cont [2/4] (short) (narrow) %v2082_v61, 32  ;;  %v2084_v39 = vpop.f32.mrb[61].mxu1 }
 0x783   : > { %v2087_v30 = vpop.f32.mrb[62].mxu1 }
 0x784   : > { %2098 = vxpose.xlu1.b32.cont [3/4] (short) (narrow) %v2087_v30, 32  ;;  %v2089_v18 = vpop.f32.mrb[63].mxu1 }
 0x787   : > { %v2092_v10 = vpop.f32.mrb[64].mxu1 }
 0x788   : > { %2099 = vxpose.xlu1.b32.end [4/4] (short) (narrow) %v2092_v10, 32  ;;  %v2094_v53 = vpop.f32.mrb[65].mxu1 }
 0x7a6   : > { %2656 = vset.pattern.permute.xlu1 %v2901_v42 }
 0x7fc   : > { %v2112_v43 = vpop.trf.xlu1 }
 0x7fd   : > { %2505 = vmatmul.mubr.msk.f32.vlgmr.msra.gmra.mrb[66].mxu1 %vm1059_vm2, %v2112_v43 }
 0x7fe   : > { %2583 = vmatpush1.bf16.msra.mxu1 %v2582_v2  ;;  %2210 = vmatprep.mubr.f32.mxu1 %v4211_v0  ;;  %v2230_v2 = vld [vmem:[%s4163_s3] sm:$0xf] }
 0x7ff   : > { %2585 = vmatprep.subr.bf16.mxu1 %v2584_v52  ;;  %2233 = vperm.xlu0 %2655, %v2230_v2  }
 0x800   : > { %v2113_v50 = vpop.trf.xlu1 }
 0x801   : > { %2506 = vmatmul.mubr.msk.f32.gmra.mrb[68].mxu1 %vm1059_vm2, %v2113_v50 }
 0x802   : > { %2587 = vmatpush1.bf16.msra.mxu1 %v2586_v27  ;;  %2216 = vmatprep.mubr.f32.mxu1 %v4211_v0 }
 0x803   : > { %2589 = vmatprep.subr.bf16.mxu1 %v2588_v31 }
 0x804   : > { %v2114_v57 = vpop.trf.xlu1 }
 0x805   : > { %2507 = vmatmul.mubr.msk.f32.gmra.mrb[70].mxu1 %vm1059_vm2, %v2114_v57 }
 0x806   : > { %2591 = vmatpush1.bf16.msra.mxu1 %v2590_v56  ;;  %2222 = vmatprep.mubr.f32.mxu1 %v4211_v0 }
 0x807   : > { %2593 = vmatprep.subr.bf16.mxu1 %v2592_v33 }
 0x808   : > { %v2115_v38 = vpop.trf.xlu1 }
 0x809   : > { %2508 = vmatmul.mubr.msk.f32.gmra.mrb[72].mxu1 %vm1059_vm2, %v2115_v38 }
 0x80a   : > { %2595 = vmatpush1.bf16.msra.mxu1 %v2594_v54  ;;  %2300 = vmatprep.mubr.f32.mxu1 %v4211_v0 }
 0x80b   : > { %2597 = vmatprep.subr.bf16.mxu1 %v2596_v19 }
 0x80e   : > { %2599 = vmatpush1.bf16.msra.mxu1 %v2598_v26 }
 0x80f   : > { %2601 = vmatprep.subr.bf16.mxu1 %v2600_v6 }
 0x812   : > { %2603 = vmatpush1.bf16.msra.mxu1 %v2602_v29 }
 0x87e   : > { %v2234_v13 = vpop.permute.xlu0 %2233 }
 0x8d0   : > { %v2206_v62 = vpop.f32.mrb[66].mxu1 }
 0x8d1   : > { %v2208_v7 = vpop.f32.mrb[67].mxu1 }
 0x8d4   : > { %v2212_v27 = vpop.f32.mrb[68].mxu1 }
 0x8d5   : > { %v2606_v34 = vpack.c.bf16 %v2212_v27, %v2206_v62  ;;  %v2214_v52 = vpop.f32.mrb[69].mxu1 }
 0x8d6   : > { %v2604_v44 = vpack.c.bf16 %v2214_v52, %v2208_v7 }
 0x8d8   : > { %v2218_v40 = vpop.f32.mrb[70].mxu1  ;;  %2605 = vmatprep.subr.bf16.mxu1 %v2604_v44 }
 0x8d9   : > { %v2220_v0 = vpop.f32.mrb[71].mxu1  ;;  %2607 = vmatpush1.bf16.msra.mxu1 %v2606_v34 }
 0x8dc   : > { %v2224_v12 = vpop.f32.mrb[72].mxu1 }
 0x8dd   : > { %v2610_v56 = vpack.c.bf16 %v2224_v12, %v2218_v40  ;;  %v2226_v24 = vpop.f32.mrb[73].mxu1 }
 0x8de   : > { %v2608_v31 = vpack.c.bf16 %v2226_v24, %v2220_v0 }
 0x8e0   : > { %2609 = vmatprep.subr.bf16.mxu1 %v2608_v31 }
 0x8e1   : > { %2611 = vmatpush1.bf16.msra.mxu1 %v2610_v56 }
 0x8e4   : > { %2301 = vmatmul.mubr.f32.vlgmr.msra.gmra.mrb[74].mxu1 %v2229_v11 }
 0x9b7   : > { %v2302_v25 = vpop.f32.mrb[74].mxu1 }
 0x9b8   : > { %v2303_v54 = vadd.f32 %v2302_v25, %v2234_v13  ;;  %v2304_v17 = vpop.f32.mrb[75].mxu1 }
 0x9b9   : > { %v2305_v33 = vadd.f32 %v2304_v17, %v2234_v13 }
 0x9ba   : > { %v2307_v9 = vsel %vm446_vm0, %v2303_v54, 0.0 }
 0x9bb   : > { %v2308_v49 = vsel %vm446_vm0, %v2305_v33, 0.0 }
 0x9bc   : > { %v2309_v55 = vadd.f32 %v2308_v49, %v2307_v9 }
 0x9be   : > { %2310 = vadd.xlane.f32.xlu1 %v2309_v55 }
 0x9cf   : > { %2344 = vperm.xlu1 %2656, %v2341_v3  }
 0x9d3   : > { %2352 = vperm.xlu1 %2656, %v2349_v23  }
 0xa4b   : > { %v2311_v60 = vpop.xlane.xlu1 %2310 }
 0xa4c   : > { %v2312_v28 = vsel %vm446_vm0, %v2311_v60, 0.0 }
 0xa4d   : > { %v2313_v35 = vrot.slane %v2312_v28, 4 }
 0xa4f   : > { %v2314_v4 = vadd.f32 %v2313_v35, %v2312_v28  ;;  %v2345_v6 = vpop.permute.xlu1 %2344 }
 0xa51   : > { %v2315_v1 = vrot.slane %v2314_v4, 2 }
 0xa53   : > { %v2316_v15 = vadd.f32 %v2315_v1, %v2314_v4  ;;  %v2353_v18 = vpop.permute.xlu1 %2352 }
 0xa55   : > { %v2317_v37 = vrot.slane %v2316_v15, 1 }
 0xa57   : > { %v2318_v8 = vadd.f32 %v2317_v37, %v2316_v15 }
 0xa59   : > { %v2319_v41 = vmul.f32 0.0009765625, %v2318_v8 }
 0xa5b   : > { %v2320_v59 = vsub.f32 %v2303_v54, %v2319_v41  ;;  %v2321_v32 = vsub.f32 %v2305_v33, %v2319_v41 }
 0xa5d   : > { %v2322_v58 = vmul.f32 %v2320_v59, %v2320_v59  ;;  %v2323_v36 = vmul.f32 %v2321_v32, %v2321_v32 }
 0xa5f   : > { %v2324_v63 = vsel %vm446_vm0, %v2322_v58, 0.0  ;;  %v2325_v48 = vsel %vm446_vm0, %v2323_v36, 0.0 }
 0xa60   : > { %v2326_v45 = vadd.f32 %v2325_v48, %v2324_v63 }
 0xa62   : > { %2327 = vadd.xlane.f32.xlu0 %v2326_v45 }
 0xaef   : > { %v2328_v22 = vpop.xlane.xlu0 %2327 }
 0xaf0   : > { %v2329_v16 = vsel %vm446_vm0, %v2328_v22, 0.0 }
 0xaf1   : > { %v2330_v26 = vrot.slane %v2329_v16, 4 }
 0xaf3   : > { %v2331_v14 = vadd.f32 %v2330_v26, %v2329_v16 }
 0xaf5   : > { %v2332_v19 = vrot.slane %v2331_v14, 2 }
 0xaf7   : > { %v2333_v20 = vadd.f32 %v2332_v19, %v2331_v14 }
 0xaf9   : > { %v2334_v51 = vrot.slane %v2333_v20, 1 }
 0xafb   : > { %v2335_v47 = vadd.f32 %v2334_v51, %v2333_v20 }
 0xafd   : > { %v2336_v29 = vmul.f32 0.0009765625, %v2335_v47 }
 0xaff   : > { %v2337_v5 = vadd.f32 1e-05, %v2336_v29 }
 0xb01   : > { %2834 = vrsqrt.f32 %v2337_v5 }
 0xb0b   : > { %v2835_v46 = vpop.eup %2834 }
 0xb0c   : > { %v2339_v21 = vmul.f32 %v2835_v46, %v2320_v59  ;;  %v2340_v61 = vmul.f32 %v2835_v46, %v2321_v32 }
 0xb0e   : > { %v2347_v39 = vmul.f32 %v2345_v6, %v2339_v21  ;;  %v2348_v30 = vmul.f32 %v2345_v6, %v2340_v61 }
 0xb10   : > { %v2355_v10 = vadd.f32 %v2353_v18, %v2347_v39  ;;  %v2356_v53 = vadd.f32 %v2353_v18, %v2348_v30 }
 0xb12   : > { %v2359_v43 = vcombine.low %v2355_v10, %v2356_v53 }
 0xb14   : > { %2361 = vst [vmem:[%s244_s16] sm:$0xff] %v2359_v43 }
 0xb15   : > { %2849 = shalt.err (!%p2846_p3)
}
 0xb16   : > { %s2850_s10 = scalar_lea.hbm %s4118_s20, 128  ;;  %s2854_s13 = scalar_lea.hbm %s4166_s6, 256 }
 0xb17   : > { %p2851_p4 = scmp.ne.s32.totalorder %s4118_s20, %s2850_s10  ;;  %p2855_p9 = scmp.lt.u32.totalorder %s4118_s20, %s4166_s6 }
 0xb18   : > { %p2856_p10 = scmp.lt.u32.totalorder %s2854_s13, %s2850_s10  ;;  %p2858_p12 = scmp.lt.u32.totalorder %s2850_s10, %s4118_s20 }
 0xb19   : > { %p2852_p7 = pnand %p2851_p4, %p2976_p5 }
 0xb1a   : > { %p2857_p11 = por %p2856_p10, %p2855_p9 }
 0xb1b   : > { %p2853_p8 = pneg %p2852_p7 }
 0xb1c   : > { %p2859_p13 = por %p2858_p12, %p2857_p11 }
 0xb1e   : > { %p2860_p0 = pnand %p2859_p13, %p2853_p8 }
 0xb20   : > { %2863 = shalt.err (!%p2860_p0)
}
 0xb21   : > { %2614 = dma.vmem_to_hbm [thread:$0]  (%p2976_p5), %s4120_s17, 128, %s4118_s20, %s2363_s26  }
 0xb22 PF: > { %p2620_p1 = scmp.ge.s32.totalorder %s2898_s24, 2  ;;  %s2389_s16 = sand.u32 1, %s2886_s21  }
 0xb23   : > { %s2390_s18 = scalar_lea.sflag [#allocation3], %s2389_s16 }
 0xb24   : > { %p2617_p2 = pnand %p2620_p1, %p2980_p6 }
 0xb26   : > { %2881 = dma.done.wait (!%p2617_p2), %s2390_s18, 128  }
 0xb27   : > { %2883 = vsyncadd (!%p2617_p2), %s2390_s18, 4294967168  ;;  %p16_p3 = scmp.ge.s32.totalorder %s2963_s27, 4   ;;  %s4280_s21 = smov %s2890_s22 }
 0xb28   : > { %s4281_s22 = smov %s2894_s23  ;;  %s4282_s23 = smov %s2974_s30 }
 0xb29   : > { %s4283_s24 = smov %s2963_s27  ;;  %18 = sbr.rel (!%p16_p3) target bundleno = 3 (0x3), region = 79 }
 0xb30   :  { %2395 = vsyncpa [#allocation3], 1 }
 0xb31   :  { %2397 = vsyncpa [#allocation3 + $0x1], 1 }

</bundles_post_ra>
